<compile_context>
chip_gen: v6e
topology: v6e:2x2x1
jax: 0.10.0
libtpu: 0.0.40
codegen_flags: <defaults>
</compile_context>

<pallas_src>
import jax
import jax.numpy as jnp
from jax.experimental import pallas as pl
from jax.experimental.pallas import tpu as pltpu

F_IN = 28 * 28                 # 784
BOTTLENECK_PAD = 128           # 64-wide code layer padded to a full lane tile
# Real (PyTorch) layer dims and the padded dims the kernel actually runs.
LAYER_DIMS = [(F_IN, 256), (256, 128), (128, 64), (64, 128), (128, 256), (256, F_IN)]
PADDED_DIMS = [(F_IN, 256), (256, 128), (128, 128), (128, 128), (128, 256), (256, F_IN)]


def _round_up(x, m):
    return (x + m - 1) // m * m


def _cdiv(a, b):
    return (a + b - 1) // b


# ----------------------------- Pallas kernel -----------------------------

def dae_kernel(x_ref,
               w1_ref, b1_ref, w2_ref, b2_ref, w3_ref, b3_ref,
               w4_ref, b4_ref, w5_ref, b5_ref, w6_ref, b6_ref,
               o_ref):
    """Full encoder+decoder chain for one batch tile.

    bf16 x bf16 matmuls on the MXU with f32 accumulation; bias add + ReLU on
    the VPU; sigmoid epilogue via tanh on the EUP (saturating, overflow-safe).
    """

    def dense(h, w_ref, b_ref, relu):
        y = jnp.dot(h.astype(w_ref.dtype), w_ref[...],
                    preferred_element_type=jnp.float32) + b_ref[...]
        return jnp.maximum(y, 0.0) if relu else y

    h = x_ref[...]                       # (TILE_B, 784), f32 or bf16
    # --- encoder ---
    h = dense(h, w1_ref, b1_ref, True)
    h = dense(h, w2_ref, b2_ref, True)
    h = dense(h, w3_ref, b3_ref, True)
    # --- decoder ---
    h = dense(h, w4_ref, b4_ref, True)
    h = dense(h, w5_ref, b5_ref, True)
    h = dense(h, w6_ref, b6_ref, False)
    # sigmoid(h) = 0.5 * (tanh(0.5*h) + 1): EUP tanh, no exp overflow.
    o_ref[...] = (0.5 * jnp.tanh(0.5 * h) + 0.5).astype(o_ref.dtype)


# ----------------------------- wrapper -----------------------------------

def _auto_tile_b(batch, max_tile=512):
    """Batch tile: big enough to amortize per-grid-step overhead, small enough
    for scoped VMEM, and >= 2 grid steps (v7x megacore) when the batch allows."""
    b8 = _round_up(batch, 8)
    if b8 <= 256:
        return b8                              # tiny batch: a single tile
    n_tiles = max(2, _cdiv(b8, max_tile))      # keep both v7x TensorCores fed
    return _round_up(_cdiv(b8, n_tiles), 8)


def denoising_network_forward(x, params, *, tile_b=None):
    """x: [B, 784] (f32 or bf16). params: prepare_params() output.

    Returns [B, 784] f32.
    """
    B, f = x.shape
    assert f == F_IN

    if tile_b is None:
        # 512 is safe on every generation under the VMEM budget below; on
        # v6e/v7x large batches can pass tile_b=1024 for extra amortization.
        tile_b = _auto_tile_b(B, max_tile=512)
    tile_b = min(tile_b, _round_up(B, 8))

    b_pad = _round_up(B, tile_b)
    if b_pad != B:
        # Remainder-row pad only (< tile_b rows) -- not a full feature re-pad.
        x = jnp.pad(x, ((0, b_pad - B), (0, 0)))

    operands = [x]
    for i in range(1, 7):
        operands += [params[f"w{i}"], params[f"b{i}"]]

    # x / out: one batch tile per grid step (last dim = full 784 array dim).
    # Weights / biases: full-array blocks with a constant index_map -> DMA'd
    # once and kept VMEM-resident across the whole grid.
    xo_spec = pl.BlockSpec((tile_b, F_IN), lambda i: (i, 0))
    in_specs = [xo_spec] + [pl.BlockSpec(op.shape, lambda i: (0, 0))
                            for op in operands[1:]]

    flops = 2 * b_pad * sum(m * n for m, n in PADDED_DIMS)
    bytes_accessed = (sum(int(op.size) * op.dtype.itemsize for op in operands)
                      + b_pad * F_IN * 4)
    cost = pl.CostEstimate(flops=flops,
                           transcendentals=b_pad * F_IN,
                           bytes_accessed=bytes_accessed)

    # Scoped-VMEM budget: double-buffered f32 x/out tiles + resident weights
    # (~2 MB) + activation scratch/slack.  32 MiB floor raises v5e's 16 MiB
    # default; capped at 64 MiB (v7x physical per-TC VMEM).
    tile_bytes = tile_b * F_IN * 4
    vmem_limit = int(min(64 * 1024 * 1024,
                         max(32 * 1024 * 1024, 6 * tile_bytes + (8 << 20))))

    out = pl.pallas_call(
        dae_kernel,
        out_shape=jax.ShapeDtypeStruct((b_pad, F_IN), jnp.float32),
        grid=(b_pad // tile_b,),
        in_specs=in_specs,
        out_specs=xo_spec,
        compiler_params=pltpu.CompilerParams(
            dimension_semantics=("parallel",),
            vmem_limit_bytes=vmem_limit),
        cost_estimate=cost,
    )(*operands)

    return out if b_pad == B else out[:B]


# ----------------------------- param init / prep --------------------------

def init_params(key):
    """Deterministic PyTorch-style init: U(-1/sqrt(fan_in), 1/sqrt(fan_in)).
    f32 master copy; weights stored already transposed to [in, out]."""
    params = {}
    for i, (fan_in, fan_out) in enumerate(LAYER_DIMS, start=1):
        key, kw, kb = jax.random.split(key, 3)
        bound = 1.0 / (fan_in ** 0.5)
        params[f"w{i}"] = jax.random.uniform(
            kw, (fan_in, fan_out), jnp.float32, minval=-bound, maxval=bound)
        params[f"b{i}"] = jax.random.uniform(
            kb, (1, fan_out), jnp.float32, minval=-bound, maxval=bound)
    return params


def prepare_params(params):
    """Quantize weights to bf16 and zero-pad the 64-wide bottleneck to 128
    (w3 output cols / b3 / w4 input rows).  Mathematically identical: padded
    units are always 0 and ReLU(0) = 0."""
    prepped = {}
    for i in range(1, 7):
        w = params[f"w{i}"].astype(jnp.bfloat16)
        b = params[f"b{i}"].astype(jnp.float32)
        if i == 3:   # 128 -> 64 layer: pad output cols (and bias) to 128
            w = jnp.pad(w, ((0, 0), (0, BOTTLENECK_PAD - 64)))
            b = jnp.pad(b, ((0, 0), (0, BOTTLENECK_PAD - 64)))
        if i == 4:   # 64 -> 128 layer: pad input rows to 128
            w = jnp.pad(w, ((0, BOTTLENECK_PAD - 64), (0, 0)))
        prepped[f"w{i}"] = w
        prepped[f"b{i}"] = b
    return prepped


# pure-JAX reference (mirrors the kernel's bf16-weight / f32-accum math)
def reference_forward(x, params_f32):
    h = x.astype(jnp.float32)
    for i in range(1, 7):
        w = params_f32[f"w{i}"].astype(jnp.bfloat16)
        b = params_f32[f"b{i}"]
        h = jnp.dot(h.astype(jnp.bfloat16), w,
                    preferred_element_type=jnp.float32) + b
        if i < 6:
            h = jnp.maximum(h, 0.0)
    return jax.nn.sigmoid(h)


# ----------------------------- main ---------------------------------------

if __name__ == "__main__":
    key = jax.random.PRNGKey(0)
    kx, kp = jax.random.split(key)

    B = 8                      # small smoke-test batch; features = 28*28 = 784
    x = jax.random.uniform(kx, (B, F_IN), jnp.float32)
    params_f32 = init_params(kp)
    params = prepare_params(params_f32)

    out = denoising_network_forward(x, params)
    out = jax.block_until_ready(out)

    ref = reference_forward(x, params_f32)
    assert out.shape == (B, F_IN)
    err = float(jnp.max(jnp.abs(out - ref)))
    # bf16 weights / bf16 activation casts => loosened tolerance vs f32 path
    assert err < 2e-2, f"Pallas output mismatch vs JAX reference (max abs err={err})"

    print("KERNEL_OK")
</pallas_src>

<mosaic_0001>
module attributes {stable_mosaic.version = 11 : i64} {
  func.func @dae_kernel(%arg0: i32, %arg1: memref<8x784xf32, #tpu.memory_space<vmem>>, %arg2: memref<784x256xbf16, #tpu.memory_space<vmem>>, %arg3: memref<1x256xf32, #tpu.memory_space<vmem>>, %arg4: memref<256x128xbf16, #tpu.memory_space<vmem>>, %arg5: memref<1x128xf32, #tpu.memory_space<vmem>>, %arg6: memref<128x128xbf16, #tpu.memory_space<vmem>>, %arg7: memref<1x128xf32, #tpu.memory_space<vmem>>, %arg8: memref<128x128xbf16, #tpu.memory_space<vmem>>, %arg9: memref<1x128xf32, #tpu.memory_space<vmem>>, %arg10: memref<128x256xbf16, #tpu.memory_space<vmem>>, %arg11: memref<1x256xf32, #tpu.memory_space<vmem>>, %arg12: memref<256x784xbf16, #tpu.memory_space<vmem>>, %arg13: memref<1x784xf32, #tpu.memory_space<vmem>>, %arg14: memref<8x784xf32, #tpu.memory_space<vmem>>) attributes {dimension_semantics = [#tpu.dimension_semantics<parallel>], iteration_bounds = array<i64: 1>, scalar_prefetch = 0 : i64, scratch_operands = 0 : i64, tpu.core_type = #tpu.core_type<tc>, window_params = [{transform_indices = @transform_0, window_bounds = array<i64: 8, 784>}, {pipeline_mode = #tpu.pipeline_mode<synchronous>, transform_indices = @transform_1, window_bounds = array<i64: 784, 256>}, {pipeline_mode = #tpu.pipeline_mode<synchronous>, transform_indices = @transform_2, window_bounds = array<i64: 1, 256>}, {pipeline_mode = #tpu.pipeline_mode<synchronous>, transform_indices = @transform_3, window_bounds = array<i64: 256, 128>}, {pipeline_mode = #tpu.pipeline_mode<synchronous>, transform_indices = @transform_4, window_bounds = array<i64: 1, 128>}, {pipeline_mode = #tpu.pipeline_mode<synchronous>, transform_indices = @transform_5, window_bounds = array<i64: 128, 128>}, {pipeline_mode = #tpu.pipeline_mode<synchronous>, transform_indices = @transform_6, window_bounds = array<i64: 1, 128>}, {pipeline_mode = #tpu.pipeline_mode<synchronous>, transform_indices = @transform_7, window_bounds = array<i64: 128, 128>}, {pipeline_mode = #tpu.pipeline_mode<synchronous>, transform_indices = @transform_8, window_bounds = array<i64: 1, 128>}, {pipeline_mode = #tpu.pipeline_mode<synchronous>, transform_indices = @transform_9, window_bounds = array<i64: 128, 256>}, {pipeline_mode = #tpu.pipeline_mode<synchronous>, transform_indices = @transform_10, window_bounds = array<i64: 1, 256>}, {pipeline_mode = #tpu.pipeline_mode<synchronous>, transform_indices = @transform_11, window_bounds = array<i64: 256, 784>}, {pipeline_mode = #tpu.pipeline_mode<synchronous>, transform_indices = @transform_12, window_bounds = array<i64: 1, 784>}, {transform_indices = @transform_13, window_bounds = array<i64: 8, 784>}]} {
    %c0 = arith.constant 0 : index
    %c0_0 = arith.constant 0 : index
    %0 = vector.load %arg1[%c0, %c0_0] : memref<8x784xf32, #tpu.memory_space<vmem>>, vector<8x784xf32>
    %1 = arith.truncf %0 : vector<8x784xf32> to vector<8x784xbf16>
    %c0_1 = arith.constant 0 : index
    %c0_2 = arith.constant 0 : index
    %2 = vector.load %arg2[%c0_1, %c0_2] : memref<784x256xbf16, #tpu.memory_space<vmem>>, vector<784x256xbf16>
    %cst = arith.constant dense<0.000000e+00> : vector<8x256xf32>
    %3 = tpu.matmul %1, %2, %cst {dimension_numbers = #tpu.dot_dimension_numbers<[1], [0], [0], [1], [0, 0, 1, 1], [], []>} : vector<8x784xbf16>, vector<784x256xbf16>, vector<8x256xf32> -> vector<8x256xf32>
    %c0_3 = arith.constant 0 : index
    %c0_4 = arith.constant 0 : index
    %4 = vector.load %arg3[%c0_3, %c0_4] : memref<1x256xf32, #tpu.memory_space<vmem>>, vector<1x256xf32>
    %5 = vector.broadcast %4 : vector<1x256xf32> to vector<8x256xf32>
    %6 = arith.addf %3, %5 : vector<8x256xf32>
    %cst_5 = arith.constant 0.000000e+00 : f32
    %7 = vector.broadcast %cst_5 : f32 to vector<8x256xf32>
    %8 = arith.maximumf %6, %7 : vector<8x256xf32>
    %9 = arith.truncf %8 : vector<8x256xf32> to vector<8x256xbf16>
    %c0_6 = arith.constant 0 : index
    %c0_7 = arith.constant 0 : index
    %10 = vector.load %arg4[%c0_6, %c0_7] : memref<256x128xbf16, #tpu.memory_space<vmem>>, vector<256x128xbf16>
    %cst_8 = arith.constant dense<0.000000e+00> : vector<8x128xf32>
    %11 = tpu.matmul %9, %10, %cst_8 {dimension_numbers = #tpu.dot_dimension_numbers<[1], [0], [0], [1], [0, 0, 1, 1], [], []>} : vector<8x256xbf16>, vector<256x128xbf16>, vector<8x128xf32> -> vector<8x128xf32>
    %c0_9 = arith.constant 0 : index
    %c0_10 = arith.constant 0 : index
    %12 = vector.load %arg5[%c0_9, %c0_10] : memref<1x128xf32, #tpu.memory_space<vmem>>, vector<1x128xf32>
    %13 = vector.broadcast %12 : vector<1x128xf32> to vector<8x128xf32>
    %14 = arith.addf %11, %13 : vector<8x128xf32>
    %cst_11 = arith.constant 0.000000e+00 : f32
    %15 = vector.broadcast %cst_11 : f32 to vector<8x128xf32>
    %16 = arith.maximumf %14, %15 : vector<8x128xf32>
    %17 = arith.truncf %16 : vector<8x128xf32> to vector<8x128xbf16>
    %c0_12 = arith.constant 0 : index
    %c0_13 = arith.constant 0 : index
    %18 = vector.load %arg6[%c0_12, %c0_13] : memref<128x128xbf16, #tpu.memory_space<vmem>>, vector<128x128xbf16>
    %cst_14 = arith.constant dense<0.000000e+00> : vector<8x128xf32>
    %19 = tpu.matmul %17, %18, %cst_14 {dimension_numbers = #tpu.dot_dimension_numbers<[1], [0], [0], [1], [0, 0, 1, 1], [], []>} : vector<8x128xbf16>, vector<128x128xbf16>, vector<8x128xf32> -> vector<8x128xf32>
    %c0_15 = arith.constant 0 : index
    %c0_16 = arith.constant 0 : index
    %20 = vector.load %arg7[%c0_15, %c0_16] : memref<1x128xf32, #tpu.memory_space<vmem>>, vector<1x128xf32>
    %21 = vector.broadcast %20 : vector<1x128xf32> to vector<8x128xf32>
    %22 = arith.addf %19, %21 : vector<8x128xf32>
    %cst_17 = arith.constant 0.000000e+00 : f32
    %23 = vector.broadcast %cst_17 : f32 to vector<8x128xf32>
    %24 = arith.maximumf %22, %23 : vector<8x128xf32>
    %25 = arith.truncf %24 : vector<8x128xf32> to vector<8x128xbf16>
    %c0_18 = arith.constant 0 : index
    %c0_19 = arith.constant 0 : index
    %26 = vector.load %arg8[%c0_18, %c0_19] : memref<128x128xbf16, #tpu.memory_space<vmem>>, vector<128x128xbf16>
    %cst_20 = arith.constant dense<0.000000e+00> : vector<8x128xf32>
    %27 = tpu.matmul %25, %26, %cst_20 {dimension_numbers = #tpu.dot_dimension_numbers<[1], [0], [0], [1], [0, 0, 1, 1], [], []>} : vector<8x128xbf16>, vector<128x128xbf16>, vector<8x128xf32> -> vector<8x128xf32>
    %c0_21 = arith.constant 0 : index
    %c0_22 = arith.constant 0 : index
    %28 = vector.load %arg9[%c0_21, %c0_22] : memref<1x128xf32, #tpu.memory_space<vmem>>, vector<1x128xf32>
    %29 = vector.broadcast %28 : vector<1x128xf32> to vector<8x128xf32>
    %30 = arith.addf %27, %29 : vector<8x128xf32>
    %cst_23 = arith.constant 0.000000e+00 : f32
    %31 = vector.broadcast %cst_23 : f32 to vector<8x128xf32>
    %32 = arith.maximumf %30, %31 : vector<8x128xf32>
    %33 = arith.truncf %32 : vector<8x128xf32> to vector<8x128xbf16>
    %c0_24 = arith.constant 0 : index
    %c0_25 = arith.constant 0 : index
    %34 = vector.load %arg10[%c0_24, %c0_25] : memref<128x256xbf16, #tpu.memory_space<vmem>>, vector<128x256xbf16>
    %cst_26 = arith.constant dense<0.000000e+00> : vector<8x256xf32>
    %35 = tpu.matmul %33, %34, %cst_26 {dimension_numbers = #tpu.dot_dimension_numbers<[1], [0], [0], [1], [0, 0, 1, 1], [], []>} : vector<8x128xbf16>, vector<128x256xbf16>, vector<8x256xf32> -> vector<8x256xf32>
    %c0_27 = arith.constant 0 : index
    %c0_28 = arith.constant 0 : index
    %36 = vector.load %arg11[%c0_27, %c0_28] : memref<1x256xf32, #tpu.memory_space<vmem>>, vector<1x256xf32>
    %37 = vector.broadcast %36 : vector<1x256xf32> to vector<8x256xf32>
    %38 = arith.addf %35, %37 : vector<8x256xf32>
    %cst_29 = arith.constant 0.000000e+00 : f32
    %39 = vector.broadcast %cst_29 : f32 to vector<8x256xf32>
    %40 = arith.maximumf %38, %39 : vector<8x256xf32>
    %41 = arith.truncf %40 : vector<8x256xf32> to vector<8x256xbf16>
    %c0_30 = arith.constant 0 : index
    %c0_31 = arith.constant 0 : index
    %42 = vector.load %arg12[%c0_30, %c0_31] : memref<256x784xbf16, #tpu.memory_space<vmem>>, vector<256x784xbf16>
    %cst_32 = arith.constant dense<0.000000e+00> : vector<8x784xf32>
    %43 = tpu.matmul %41, %42, %cst_32 {dimension_numbers = #tpu.dot_dimension_numbers<[1], [0], [0], [1], [0, 0, 1, 1], [], []>} : vector<8x256xbf16>, vector<256x784xbf16>, vector<8x784xf32> -> vector<8x784xf32>
    %c0_33 = arith.constant 0 : index
    %c0_34 = arith.constant 0 : index
    %44 = vector.load %arg13[%c0_33, %c0_34] : memref<1x784xf32, #tpu.memory_space<vmem>>, vector<1x784xf32>
    %45 = vector.broadcast %44 : vector<1x784xf32> to vector<8x784xf32>
    %46 = arith.addf %43, %45 : vector<8x784xf32>
    %cst_35 = arith.constant 5.000000e-01 : f32
    %47 = vector.broadcast %cst_35 : f32 to vector<8x784xf32>
    %48 = arith.mulf %47, %46 : vector<8x784xf32>
    %49 = math.tanh %48 : vector<8x784xf32>
    %cst_36 = arith.constant 5.000000e-01 : f32
    %50 = vector.broadcast %cst_36 : f32 to vector<8x784xf32>
    %51 = arith.mulf %50, %49 : vector<8x784xf32>
    %cst_37 = arith.constant 5.000000e-01 : f32
    %52 = vector.broadcast %cst_37 : f32 to vector<8x784xf32>
    %53 = arith.addf %51, %52 : vector<8x784xf32>
    %c0_38 = arith.constant 0 : index
    %c0_39 = arith.constant 0 : index
    %54 = vector.load %arg14[%c0_38, %c0_39] : memref<8x784xf32, #tpu.memory_space<vmem>>, vector<8x784xf32>
    tpu.vector_store %arg14[%c0_38, %c0_39], %53 {strides = array<i32>} : memref<8x784xf32, #tpu.memory_space<vmem>>, vector<8x784xf32>,
    return
  }
  func.func @transform_0(%arg0: i32) -> (i32, i32) {
    %c0_i32 = arith.constant 0 : i32
    %c0_i32_0 = arith.constant 0 : i32
    return %arg0, %c0_i32 : i32, i32
  }
  func.func @transform_1(%arg0: i32) -> (i32, i32) {
    %c0_i32 = arith.constant 0 : i32
    %c0_i32_0 = arith.constant 0 : i32
    %c0_i32_1 = arith.constant 0 : i32
    return %c0_i32, %c0_i32_0 : i32, i32
  }
  func.func @transform_2(%arg0: i32) -> (i32, i32) {
    %c0_i32 = arith.constant 0 : i32
    %c0_i32_0 = arith.constant 0 : i32
    %c0_i32_1 = arith.constant 0 : i32
    return %c0_i32, %c0_i32_0 : i32, i32
  }
  func.func @transform_3(%arg0: i32) -> (i32, i32) {
    %c0_i32 = arith.constant 0 : i32
    %c0_i32_0 = arith.constant 0 : i32
    %c0_i32_1 = arith.constant 0 : i32
    return %c0_i32, %c0_i32_0 : i32, i32
  }
  func.func @transform_4(%arg0: i32) -> (i32, i32) {
    %c0_i32 = arith.constant 0 : i32
    %c0_i32_0 = arith.constant 0 : i32
    %c0_i32_1 = arith.constant 0 : i32
    return %c0_i32, %c0_i32_0 : i32, i32
  }
  func.func @transform_5(%arg0: i32) -> (i32, i32) {
    %c0_i32 = arith.constant 0 : i32
    %c0_i32_0 = arith.constant 0 : i32
    %c0_i32_1 = arith.constant 0 : i32
    return %c0_i32, %c0_i32_0 : i32, i32
  }
  func.func @transform_6(%arg0: i32) -> (i32, i32) {
    %c0_i32 = arith.constant 0 : i32
    %c0_i32_0 = arith.constant 0 : i32
    %c0_i32_1 = arith.constant 0 : i32
    return %c0_i32, %c0_i32_0 : i32, i32
  }
  func.func @transform_7(%arg0: i32) -> (i32, i32) {
    %c0_i32 = arith.constant 0 : i32
    %c0_i32_0 = arith.constant 0 : i32
    %c0_i32_1 = arith.constant 0 : i32
    return %c0_i32, %c0_i32_0 : i32, i32
  }
  func.func @transform_8(%arg0: i32) -> (i32, i32) {
    %c0_i32 = arith.constant 0 : i32
    %c0_i32_0 = arith.constant 0 : i32
    %c0_i32_1 = arith.constant 0 : i32
    return %c0_i32, %c0_i32_0 : i32, i32
  }
  func.func @transform_9(%arg0: i32) -> (i32, i32) {
    %c0_i32 = arith.constant 0 : i32
    %c0_i32_0 = arith.constant 0 : i32
    %c0_i32_1 = arith.constant 0 : i32
    return %c0_i32, %c0_i32_0 : i32, i32
  }
  func.func @transform_10(%arg0: i32) -> (i32, i32) {
    %c0_i32 = arith.constant 0 : i32
    %c0_i32_0 = arith.constant 0 : i32
    %c0_i32_1 = arith.constant 0 : i32
    return %c0_i32, %c0_i32_0 : i32, i32
  }
  func.func @transform_11(%arg0: i32) -> (i32, i32) {
    %c0_i32 = arith.constant 0 : i32
    %c0_i32_0 = arith.constant 0 : i32
    %c0_i32_1 = arith.constant 0 : i32
    return %c0_i32, %c0_i32_0 : i32, i32
  }
  func.func @transform_12(%arg0: i32) -> (i32, i32) {
    %c0_i32 = arith.constant 0 : i32
    %c0_i32_0 = arith.constant 0 : i32
    %c0_i32_1 = arith.constant 0 : i32
    return %c0_i32, %c0_i32_0 : i32, i32
  }
  func.func @transform_13(%arg0: i32) -> (i32, i32) {
    %c0_i32 = arith.constant 0 : i32
    %c0_i32_0 = arith.constant 0 : i32
    return %arg0, %c0_i32 : i32, i32
  }
}

</mosaic_0001>

<bundles_post_ra>
// kernel: tpu_custom_call.1
= control target key start
LH: loop header
LB: loop body
LE: loop exit
PB: predicated region body
PF: predicated region fallthrough
CT: control target
= control target key end

     0   :  { %vm660_vm0 = vcmask 130048   ;;  %s4045_s0 = inlined_call_operand.vmem [shape: f32[8,784], index: 0, kind: input, shape index: {}]   ;;  %s4046_s1 = inlined_call_operand.vmem [shape: bf16[784,256], index: 1, kind: input, shape index: {}]   ;;  %s4047_s2 = inlined_call_operand.vmem [shape: f32[1,256], index: 2, kind: input, shape index: {}]   ;;  %s4048_s3 = inlined_call_operand.vmem [shape: bf16[256,128], index: 3, kind: input, shape index: {}]   ;;  %s4049_s4 = inlined_call_operand.vmem [shape: f32[1,128], index: 4, kind: input, shape index: {}]   ;;  %s4050_s5 = inlined_call_operand.vmem [shape: bf16[128,128], index: 5, kind: input, shape index: {}]   ;;  %s4051_s6 = inlined_call_operand.vmem [shape: f32[1,128], index: 6, kind: input, shape index: {}]   ;;  %s4052_s7 = inlined_call_operand.vmem [shape: bf16[128,128], index: 7, kind: input, shape index: {}]   ;;  %s4053_s8 = inlined_call_operand.vmem [shape: f32[1,128], index: 8, kind: input, shape index: {}]   ;;  %s4054_s9 = inlined_call_operand.vmem [shape: bf16[128,256], index: 9, kind: input, shape index: {}]   ;;  %s4055_s10 = inlined_call_operand.vmem [shape: f32[1,256], index: 10, kind: input, shape index: {}]   ;;  %s4056_s11 = inlined_call_operand.vmem [shape: bf16[256,784], index: 11, kind: input, shape index: {}]   ;;  %s4057_s12 = inlined_call_operand.vmem [shape: f32[1,784], index: 12, kind: input, shape index: {}]   ;;  %s4058_s13 = inlined_call_operand.hbm [shape: f32[8,784], index: 13, kind: output, shape index: {}]  }
   0x1   :  { %v2709_v0 = vld [vmem:[%s4046_s1 + $0x74] ss:$8 sps:$4 sm:$0xff]   ;;  %v2711_v1 = vld [vmem:[%s4046_s1 + $0x70] ss:$8 sps:$4 sm:$0xff]   ;;  %v2715_v4 = vld [vmem:[%s4046_s1 + $0x64] ss:$8 sps:$4 sm:$0xff]  }
   0x2   :  { %664 = vmatprep.subr.bf16.mxu0 %v2709_v0  ;;  %v2712_v2 = vld [vmem:[%s4046_s1 + $0x174] ss:$8 sps:$4 sm:$0xff]   ;;  %v2714_v3 = vld [vmem:[%s4046_s1 + $0x170] ss:$8 sps:$4 sm:$0xff]   ;;  %v2717_v5 = vld [vmem:[%s4046_s1 + $0x60] ss:$8 sps:$4 sm:$0xff]  }
   0x3   :  { %665 = vmatpush1.bf16.msra.mxu0 %v2711_v1  ;;  %705 = vmatprep.subr.bf16.mxu1 %v2712_v2  ;;  %v2718_v6 = vld [vmem:[%s4046_s1 + $0x164] ss:$8 sps:$4 sm:$0xff]   ;;  %v2720_v7 = vld [vmem:[%s4046_s1 + $0x160] ss:$8 sps:$4 sm:$0xff]   ;;  %v2721_v8 = vld [vmem:[%s4046_s1 + $0x54] ss:$8 sps:$4 sm:$0xff]  }
   0x4   :  { %706 = vmatpush1.bf16.msra.mxu1 %v2714_v3  ;;  %666 = vmatprep.subr.bf16.mxu0 %v2715_v4  ;;  %v2723_v9 = vld [vmem:[%s4046_s1 + $0x50] ss:$8 sps:$4 sm:$0xff]   ;;  %v2724_v10 = vld [vmem:[%s4046_s1 + $0x154] ss:$8 sps:$4 sm:$0xff]   ;;  %v2727_v11 = vld [vmem:[%s4046_s1 + $0x44] ss:$8 sps:$4 sm:$0xff]  }
   0x5   :  { %707 = vmatprep.subr.bf16.mxu1 %v2718_v6  ;;  %v2726_v12 = vld [vmem:[%s4046_s1 + $0x150] ss:$8 sps:$4 sm:$0xff]   ;;  %v2730_v13 = vld [vmem:[%s4046_s1 + $0x144] ss:$8 sps:$4 sm:$0xff]   ;;  %v2729_v14 = vld [vmem:[%s4046_s1 + $0x40] ss:$8 sps:$4 sm:$0xff]  }
   0x6   :  { %v2733_v15 = vld [vmem:[%s4046_s1 + $0x34] ss:$8 sps:$4 sm:$0xff]   ;;  %v2732_v16 = vld [vmem:[%s4046_s1 + $0x140] ss:$8 sps:$4 sm:$0xff]   ;;  %v2735_v18 = vld [vmem:[%s4046_s1 + $0x30] ss:$8 sps:$4 sm:$0xff]  }
   0x7   :  { %667 = vmatpush1.bf16.msra.mxu0 %v2717_v5  ;;  %v2736_v17 = vld [vmem:[%s4046_s1 + $0x134] ss:$8 sps:$4 sm:$0xff]   ;;  %v2739_v19 = vld [vmem:[%s4046_s1 + $0x24] ss:$8 sps:$4 sm:$0xff]   ;;  %v2738_v20 = vld [vmem:[%s4046_s1 + $0x130] ss:$8 sps:$4 sm:$0xff]  }
   0x8   :  { %668 = vmatprep.subr.bf16.mxu0 %v2721_v8  ;;  %708 = vmatpush1.bf16.msra.mxu1 %v2720_v7  ;;  %v2742_v21 = vld [vmem:[%s4046_s1 + $0x124] ss:$8 sps:$4 sm:$0xff]   ;;  %v2741_v22 = vld [vmem:[%s4046_s1 + $0x20] ss:$8 sps:$4 sm:$0xff]   ;;  %v2745_v23 = vld [vmem:[%s4046_s1 + $0x14] ss:$8 sps:$4 sm:$0xff]  }
   0x9   :  { %709 = vmatprep.subr.bf16.mxu1 %v2724_v10  ;;  %v2744_v24 = vld [vmem:[%s4046_s1 + $0x120] ss:$8 sps:$4 sm:$0xff]   ;;  %v2748_v25 = vld [vmem:[%s4046_s1 + $0x114] ss:$8 sps:$4 sm:$0xff]   ;;  %v2747_v26 = vld [vmem:[%s4046_s1 + $0x10] ss:$8 sps:$4 sm:$0xff]  }
   0xa   :  { %v2751_v27 = vld [vmem:[%s4046_s1 + $0x4] ss:$8 sps:$4 sm:$0xff]   ;;  %v2750_v28 = vld [vmem:[%s4046_s1 + $0x110] ss:$8 sps:$4 sm:$0xff]   ;;  %v2753_v30 = vld [vmem:[%s4046_s1] ss:$8 sps:$4 sm:$0xff]  }
   0xb   :  { %669 = vmatpush1.bf16.msra.mxu0 %v2723_v9  ;;  %v2754_v29 = vld [vmem:[%s4046_s1 + $0x104] ss:$8 sps:$4 sm:$0xff]   ;;  %v2757_v31 = vld [vmem:[%s4046_s1 + $0xf4] ss:$8 sps:$4 sm:$0xff]   ;;  %v2756_v32 = vld [vmem:[%s4046_s1 + $0x100] ss:$8 sps:$4 sm:$0xff]  }
   0xc   :  { %670 = vmatprep.subr.bf16.mxu0 %v2727_v11  ;;  %710 = vmatpush1.bf16.msra.mxu1 %v2726_v12  ;;  %v2760_v33 = vld [vmem:[%s4046_s1 + $0x1f4] ss:$8 sps:$4 sm:$0xff]   ;;  %v2759_v34 = vld [vmem:[%s4046_s1 + $0xf0] ss:$8 sps:$4 sm:$0xff]   ;;  %v2763_v35 = vld [vmem:[%s4046_s1 + $0xe4] ss:$8 sps:$4 sm:$0xff]  }
   0xd   :  { %711 = vmatprep.subr.bf16.mxu1 %v2730_v13  ;;  %v2762_v36 = vld [vmem:[%s4046_s1 + $0x1f0] ss:$8 sps:$4 sm:$0xff]   ;;  %v2766_v37 = vld [vmem:[%s4046_s1 + $0x1e4] ss:$8 sps:$4 sm:$0xff]   ;;  %v2765_v38 = vld [vmem:[%s4046_s1 + $0xe0] ss:$8 sps:$4 sm:$0xff]  }
   0xe   :  { %v2769_v39 = vld [vmem:[%s4046_s1 + $0xd4] ss:$8 sps:$4 sm:$0xff]   ;;  %v2768_v40 = vld [vmem:[%s4046_s1 + $0x1e0] ss:$8 sps:$4 sm:$0xff]   ;;  %v2771_v42 = vld [vmem:[%s4046_s1 + $0xd0] ss:$8 sps:$4 sm:$0xff]  }
   0xf   :  { %671 = vmatpush1.bf16.msra.mxu0 %v2729_v14  ;;  %v2772_v41 = vld [vmem:[%s4046_s1 + $0x1d4] ss:$8 sps:$4 sm:$0xff]   ;;  %v2775_v43 = vld [vmem:[%s4046_s1 + $0xc4] ss:$8 sps:$4 sm:$0xff]   ;;  %v2774_v44 = vld [vmem:[%s4046_s1 + $0x1d0] ss:$8 sps:$4 sm:$0xff]  }
  0x10   :  { %672 = vmatprep.subr.bf16.mxu0 %v2733_v15  ;;  %712 = vmatpush1.bf16.msra.mxu1 %v2732_v16  ;;  %v2778_v45 = vld [vmem:[%s4046_s1 + $0x1c4] ss:$8 sps:$4 sm:$0xff]   ;;  %v2777_v47 = vld [vmem:[%s4046_s1 + $0xc0] ss:$8 sps:$4 sm:$0xff]   ;;  %v2781_v49 = vld [vmem:[%s4046_s1 + $0xb4] ss:$8 sps:$4 sm:$0xff]  }
  0x11   :  { %713 = vmatprep.subr.bf16.mxu1 %v2736_v17  ;;  %v47_v46 = vld [vmem:[%s4045_s0 + $0x8] sm:$0xff]  ;;  %v49_v50 = vld [vmem:[%s4045_s0 + $0x18] sm:$0xff]  ;;  %v46_v4 = vld [vmem:[%s4045_s0] sm:$0xff] }
  0x12   :  { %v54_v48 = vpack.c.bf16 %v47_v46, %v47_v46  ;;  %v2780_v51 = vld [vmem:[%s4046_s1 + $0x1c0] ss:$8 sps:$4 sm:$0xff]   ;;  %v56_v52 = vpack.c.bf16 %v49_v50, %v49_v50  ;;  %v2784_v53 = vld [vmem:[%s4046_s1 + $0x1b4] ss:$8 sps:$4 sm:$0xff]   ;;  %v2783_v54 = vld [vmem:[%s4046_s1 + $0xb0] ss:$8 sps:$4 sm:$0xff]   ;;  %v53_v7 = vpack.c.bf16 %v46_v4, %v46_v4 }
  0x13   :  { %673 = vmatpush1.bf16.msra.mxu0 %v2735_v18  ;;  %v2787_v55 = vld [vmem:[%s4046_s1 + $0xa4] ss:$8 sps:$4 sm:$0xff]   ;;  %v2786_v56 = vld [vmem:[%s4046_s1 + $0x1b0] ss:$8 sps:$4 sm:$0xff]   ;;  %v2789_v58 = vld [vmem:[%s4046_s1 + $0xa0] ss:$8 sps:$4 sm:$0xff]  }
  0x14   :  { %674 = vmatprep.subr.bf16.mxu0 %v2739_v19  ;;  %714 = vmatpush1.bf16.msra.mxu1 %v2738_v20  ;;  %v2790_v57 = vld [vmem:[%s4046_s1 + $0x1a4] ss:$8 sps:$4 sm:$0xff]   ;;  %v2793_v59 = vld [vmem:[%s4046_s1 + $0x94] ss:$8 sps:$4 sm:$0xff]   ;;  %v2792_v60 = vld [vmem:[%s4046_s1 + $0x1a0] ss:$8 sps:$4 sm:$0xff]  }
  0x15   :  { %715 = vmatprep.subr.bf16.mxu1 %v2742_v21  ;;  %696 = vmatprep.mubr.bf16.mxu0 %v54_v48  ;;  %v2796_v61 = vld [vmem:[%s4046_s1 + $0x194] ss:$8 sps:$4 sm:$0xff]   ;;  %v2795_v62 = vld [vmem:[%s4046_s1 + $0x90] ss:$8 sps:$4 sm:$0xff]   ;;  %v2799_v63 = vld [vmem:[%s4046_s1 + $0x84] ss:$8 sps:$4 sm:$0xff]  }
  0x16   :  { %737 = vmatprep.mubr.bf16.mxu1 %v56_v52  ;;  %v2798_v0 = vld [vmem:[%s4046_s1 + $0x190] ss:$8 sps:$4 sm:$0xff]   ;;  %v2801_v1 = vld [vmem:[%s4046_s1 + $0x80] ss:$8 sps:$4 sm:$0xff]   ;;  %v2802_v2 = vld [vmem:[%s4046_s1 + $0x184] ss:$8 sps:$4 sm:$0xff]  }
  0x17   :  { %675 = vmatpush1.bf16.msra.mxu0 %v2741_v22  ;;  %v2804_v3 = vld [vmem:[%s4046_s1 + $0x180] ss:$8 sps:$4 sm:$0xff]   ;;  %v2807_v5 = vld [vmem:[%s4046_s1 + $0x274] ss:$8 sps:$4 sm:$0xff]   ;;  %v2805_v8 = vld [vmem:[%s4046_s1 + $0x270] ss:$8 sps:$4 sm:$0xff]  }
  0x18   :  { %676 = vmatprep.subr.bf16.mxu0 %v2745_v23  ;;  %716 = vmatpush1.bf16.msra.mxu1 %v2744_v24  ;;  %v48_v6 = vld [vmem:[%s4045_s0 + $0x10] sm:$0xff]  ;;  %v2810_v9 = vld [vmem:[%s4046_s1 + $0x264] ss:$8 sps:$4 sm:$0xff]   ;;  %v2850_v11 = vld [vmem:[%s4046_s1 + $0x300] ss:$8 sps:$4 sm:$0xff]   ;;  %v3108_v19 = vmov 0  }
  0x19   :  { %717 = vmatprep.subr.bf16.mxu1 %v2748_v25  ;;  %v55_v10 = vpack.c.bf16 %v48_v6, %v48_v6  ;;  %v2852_v12 = vld [vmem:[%s4046_s1 + $0x304] ss:$8 sps:$4 sm:$0xff]   ;;  %v2808_v13 = vld [vmem:[%s4046_s1 + $0x260] ss:$8 sps:$4 sm:$0xff]   ;;  %v2813_v14 = vld [vmem:[%s4046_s1 + $0x254] ss:$8 sps:$4 sm:$0xff]  }
  0x1a   :  { %v52_v15 = vld [vmem:[%s4045_s0 + $0x30] sm:$0xff]  ;;  %v51_v16 = vld [vmem:[%s4045_s0 + $0x28] sm:$0xff]  ;;  %v2857_v50 = vld [vmem:[%s4048_s3 + $0x38] sm:$0xff]  }
  0x1b   :  { %677 = vmatpush1.bf16.msra.mxu0 %v2747_v26  ;;  %v58_v17 = vpack.c.bf16 %v51_v16, %v51_v16  ;;  %v2811_v18 = vld [vmem:[%s4046_s1 + $0x250] ss:$8 sps:$4 sm:$0xff]   ;;  %v2816_v20 = vld [vmem:[%s4046_s1 + $0x244] ss:$8 sps:$4 sm:$0xff]   ;;  %v59_v21 = vpack.c.bf16 %v52_v15, %v52_v15  ;;  %v2814_v22 = vld [vmem:[%s4046_s1 + $0x240] ss:$8 sps:$4 sm:$0xff]  }
  0x1c   :  { %678 = vmatprep.subr.bf16.mxu0 %v2751_v27  ;;  %718 = vmatpush1.bf16.msra.mxu1 %v2750_v28  ;;  %v2819_v23 = vld [vmem:[%s4046_s1 + $0x234] ss:$8 sps:$4 sm:$0xff]   ;;  %v2817_v24 = vld [vmem:[%s4046_s1 + $0x230] ss:$8 sps:$4 sm:$0xff]   ;;  %v2822_v25 = vld [vmem:[%s4046_s1 + $0x224] ss:$8 sps:$4 sm:$0xff]  }
  0x1d   :  { %719 = vmatprep.subr.bf16.mxu1 %v2754_v29  ;;  %v2820_v26 = vld [vmem:[%s4046_s1 + $0x220] ss:$8 sps:$4 sm:$0xff]   ;;  %v2825_v27 = vld [vmem:[%s4046_s1 + $0x214] ss:$8 sps:$4 sm:$0xff]   ;;  %v2823_v28 = vld [vmem:[%s4046_s1 + $0x210] ss:$8 sps:$4 sm:$0xff]  }
  0x1e   :  { %v2828_v29 = vld [vmem:[%s4046_s1 + $0x204] ss:$8 sps:$4 sm:$0xff]   ;;  %v2853_v46 = vld [vmem:[%s4046_s1 + $0x280] ss:$8 sps:$4 sm:$0xff]   ;;  %v2859_v52 = vld [vmem:[%s4048_s3 + $0x30] sm:$0xff]  }
  0x1f   :  { %679 = vmatpush1.bf16.msra.mxu0 %v2753_v30  ;;  %v2826_v30 = vld [vmem:[%s4046_s1 + $0x200] ss:$8 sps:$4 sm:$0xff]  }
  0x20   :  { %680 = vmatprep.subr.bf16.mxu0 %v2757_v31  ;;  %720 = vmatpush1.bf16.msra.mxu1 %v2756_v32  ;;  %v2831_v31 = vld [vmem:[%s4046_s1 + $0x2f4] ss:$8 sps:$4 sm:$0xff]   ;;  %v2829_v32 = vld [vmem:[%s4046_s1 + $0x2f0] ss:$8 sps:$4 sm:$0xff]  }
  0x21   :  { %721 = vmatprep.subr.bf16.mxu1 %v2760_v33  ;;  %v2834_v33 = vld [vmem:[%s4046_s1 + $0x2e4] ss:$8 sps:$4 sm:$0xff]  }
  0x23   :  { %681 = vmatpush2.bf16.msra.mxu0 %v2759_v34  ;;  %v2832_v34 = vld [vmem:[%s4046_s1 + $0x2e0] ss:$8 sps:$4 sm:$0xff]  }
  0x24   :  { %682 = vmatprep.subr.bf16.mxu0 %v2763_v35  ;;  %722 = vmatpush2.bf16.msra.mxu1 %v2762_v36  ;;  %v2837_v35 = vld [vmem:[%s4046_s1 + $0x2d4] ss:$8 sps:$4 sm:$0xff]   ;;  %v2835_v36 = vld [vmem:[%s4046_s1 + $0x2d0] ss:$8 sps:$4 sm:$0xff]  }
  0x25   :  { %723 = vmatprep.subr.bf16.mxu1 %v2766_v37  ;;  %v2840_v37 = vld [vmem:[%s4046_s1 + $0x2c4] ss:$8 sps:$4 sm:$0xff]  }
  0x27   :  { %683 = vmatpush2.bf16.msra.mxu0 %v2765_v38  ;;  %v2838_v38 = vld [vmem:[%s4046_s1 + $0x2c0] ss:$8 sps:$4 sm:$0xff]  }
  0x28   :  { %684 = vmatprep.subr.bf16.mxu0 %v2769_v39  ;;  %724 = vmatpush2.bf16.msra.mxu1 %v2768_v40  ;;  %v2843_v39 = vld [vmem:[%s4046_s1 + $0x2b4] ss:$8 sps:$4 sm:$0xff]   ;;  %v2841_v40 = vld [vmem:[%s4046_s1 + $0x2b0] ss:$8 sps:$4 sm:$0xff]  }
  0x29   :  { %725 = vmatprep.subr.bf16.mxu1 %v2772_v41  ;;  %v2846_v41 = vld [vmem:[%s4046_s1 + $0x2a4] ss:$8 sps:$4 sm:$0xff]  }
  0x2b   :  { %685 = vmatpush2.bf16.msra.mxu0 %v2771_v42  ;;  %v2844_v42 = vld [vmem:[%s4046_s1 + $0x2a0] ss:$8 sps:$4 sm:$0xff]  }
  0x2c   :  { %686 = vmatprep.subr.bf16.mxu0 %v2775_v43  ;;  %726 = vmatpush2.bf16.msra.mxu1 %v2774_v44  ;;  %v2849_v43 = vld [vmem:[%s4046_s1 + $0x294] ss:$8 sps:$4 sm:$0xff]   ;;  %v2847_v44 = vld [vmem:[%s4046_s1 + $0x290] ss:$8 sps:$4 sm:$0xff]  }
  0x2d   :  { %727 = vmatprep.subr.bf16.mxu1 %v2778_v45  ;;  %v2855_v45 = vld [vmem:[%s4046_s1 + $0x284] ss:$8 sps:$4 sm:$0xff]  }
  0x2f   :  { %687 = vmatpush2.bf16.msra.mxu0 %v2777_v47  ;;  %v50_v47 = vld [vmem:[%s4045_s0 + $0x20] sm:$0xff] }
  0x30   :  { %688 = vmatprep.subr.bf16.mxu0 %v2781_v49  ;;  %728 = vmatpush2.bf16.msra.mxu1 %v2780_v51  ;;  %v57_v48 = vpack.c.bf16 %v50_v47, %v50_v47  ;;  %v2856_v49 = vld [vmem:[%s4048_s3 + $0x78] sm:$0xff]   ;;  %v2858_v51 = vld [vmem:[%s4048_s3 + $0x70] sm:$0xff]  }
  0x31   :  { %729 = vmatprep.subr.bf16.mxu1 %v2784_v53  ;;  %v2860_v53 = vld [vmem:[%s4048_s3 + $0x68] sm:$0xff]  }
  0x33   :  { %689 = vmatpush2.bf16.msra.mxu0 %v2783_v54 }
  0x34   :  { %690 = vmatprep.subr.bf16.mxu0 %v2787_v55  ;;  %730 = vmatpush2.bf16.msra.mxu1 %v2786_v56 }
  0x35   :  { %731 = vmatprep.subr.bf16.mxu1 %v2790_v57 }
  0x37   :  { %691 = vmatpush2.bf16.msra.mxu0 %v2789_v58 }
  0x38   :  { %692 = vmatprep.subr.bf16.mxu0 %v2793_v59  ;;  %732 = vmatpush2.bf16.msra.mxu1 %v2792_v60 }
  0x39   :  { %733 = vmatprep.subr.bf16.mxu1 %v2796_v61 }
  0x3b   :  { %693 = vmatpush2.bf16.msra.mxu0 %v2795_v62 }
  0x3c   :  { %694 = vmatprep.subr.bf16.mxu0 %v2799_v63  ;;  %734 = vmatpush2.bf16.msra.mxu1 %v2798_v0 }
  0x3d   :  { %735 = vmatprep.subr.bf16.mxu1 %v2802_v2 }
  0x3f   :  { %695 = vmatpush2.bf16.msra.mxu0 %v2801_v1 }
  0x40   :  { %746 = vmatprep.subr.bf16.mxu0 %v2807_v5  ;;  %736 = vmatpush2.bf16.msra.mxu1 %v2804_v3 }
  0x41   :  { %801 = vmatprep.subr.bf16.mxu1 %v2852_v12 }
  0x42   :  { %697 = vmatmul.mubr.bf16.vlgmr.msra.gmra.mxu0 %v53_v7 }
  0x43   :  { %747 = vmatpush1.bf16.msra.mxu0 %v2805_v8  ;;  %738 = vmatmul.mubr.bf16.vlgmr.msra.gmra.mxu1 %v55_v10 }
  0x44   :  { %748 = vmatprep.subr.bf16.mxu0 %v2810_v9  ;;  %802 = vmatpush1.bf16.msra.mxu1 %v2850_v11 }
  0x45   :  { %819 = vmatprep.mubr.bf16.mxu1 %v3108_v19  ;;  %778 = vmatprep.mubr.bf16.mxu0 %v58_v17 }
  0x46   :  { %2603 = vmatprep.subr.bf16.mxu1 %v2856_v49 }
  0x47   :  { %749 = vmatpush1.bf16.msra.mxu0 %v2808_v13 }
  0x48   :  { %750 = vmatprep.subr.bf16.mxu0 %v2813_v14 }
  0x4b   :  { %751 = vmatpush1.bf16.msra.mxu0 %v2811_v18  ;;  %2439 = vmatmul.mubr.msk.bf16.vlgmr.msra.gmra.mxu1 %vm660_vm0, %v59_v21 }
  0x4c   :  { %752 = vmatprep.subr.bf16.mxu0 %v2816_v20  ;;  %2604 = vmatpush3.bf16.msra.mxu1 %v2857_v50 }
  0x4d   :  { %2605 = vmatprep.subr.bf16.mxu1 %v2858_v51 }
  0x4f   :  { %753 = vmatpush1.bf16.msra.mxu0 %v2814_v22 }
  0x50   :  { %754 = vmatprep.subr.bf16.mxu0 %v2819_v23 }
  0x53   :  { %755 = vmatpush1.bf16.msra.mxu0 %v2817_v24 }
  0x54   :  { %756 = vmatprep.subr.bf16.mxu0 %v2822_v25 }
  0x57   :  { %757 = vmatpush1.bf16.msra.mxu0 %v2820_v26 }
  0x58   :  { %758 = vmatprep.subr.bf16.mxu0 %v2825_v27 }
  0x5b   :  { %759 = vmatpush1.bf16.msra.mxu0 %v2823_v28 }
  0x5c   :  { %760 = vmatprep.subr.bf16.mxu0 %v2828_v29 }
  0x5f   :  { %761 = vmatpush1.bf16.msra.mxu0 %v2826_v30 }
  0x60   :  { %762 = vmatprep.subr.bf16.mxu0 %v2831_v31 }
  0x63   :  { %763 = vmatpush2.bf16.msra.mxu0 %v2829_v32 }
  0x64   :  { %764 = vmatprep.subr.bf16.mxu0 %v2834_v33 }
  0x67   :  { %765 = vmatpush2.bf16.msra.mxu0 %v2832_v34 }
  0x68   :  { %766 = vmatprep.subr.bf16.mxu0 %v2837_v35 }
  0x6b   :  { %767 = vmatpush2.bf16.msra.mxu0 %v2835_v36 }
  0x6c   :  { %768 = vmatprep.subr.bf16.mxu0 %v2840_v37 }
  0x6f   :  { %769 = vmatpush2.bf16.msra.mxu0 %v2838_v38 }
  0x70   :  { %770 = vmatprep.subr.bf16.mxu0 %v2843_v39 }
  0x73   :  { %771 = vmatpush2.bf16.msra.mxu0 %v2841_v40 }
  0x74   :  { %772 = vmatprep.subr.bf16.mxu0 %v2846_v41 }
  0x77   :  { %773 = vmatpush2.bf16.msra.mxu0 %v2844_v42 }
  0x78   :  { %774 = vmatprep.subr.bf16.mxu0 %v2849_v43 }
  0x7b   :  { %775 = vmatpush2.bf16.msra.mxu0 %v2847_v44 }
  0x7c   :  { %776 = vmatprep.subr.bf16.mxu0 %v2855_v45 }
  0x7f   :  { %777 = vmatpush2.bf16.msra.mxu0 %v2853_v46 }
  0x82   :  { %779 = vmatmul.mubr.bf16.vlgmr.msra.gmra.mxu0 %v57_v48 }
  0x83   :  { %18 = vsyncpa [#allocation3], 0  ;;  %2606 = vmatpush3.bf16.msra.mxu1 %v2859_v52  ;;  %v2861_v54 = vld [vmem:[%s4048_s3 + $0x28] sm:$0xff]   ;;  %v2862_v55 = vld [vmem:[%s4048_s3 + $0x60] sm:$0xff]   ;;  %v3109_v1 = vmov 0.0   ;;  %v160_v14 = vlaneseq  ;;  %vm3110_vm1 = vmmov 0  }
  0x84   :  { %2607 = vmatprep.subr.bf16.mxu1 %v2860_v53  ;;  %v2863_v56 = vld [vmem:[%s4048_s3 + $0x20] sm:$0xff]   ;;  %v2864_v57 = vld [vmem:[%s4048_s3 + $0x58] sm:$0xff]   ;;  %v2866_v59 = vld [vmem:[%s4048_s3 + $0x50] sm:$0xff]   ;;  %2685 = vmatprep.subr.bf16.mxu0 %v3109_v1 }
  0x85   :  { %v2865_v58 = vld [vmem:[%s4048_s3 + $0x18] sm:$0xff]   ;;  %v2867_v60 = vld [vmem:[%s4048_s3 + $0x10] sm:$0xff]   ;;  %v2868_v61 = vld [vmem:[%s4048_s3 + $0x48] sm:$0xff]   ;;  %v3549_v15 = vshrl.u32 %v160_v14, 7  ;;  %2701 = vmatprep.mubr.msk.bf16.mxu0 %vm3110_vm1, %v3109_v1 }
  0x86   :  { %v2869_v62 = vld [vmem:[%s4048_s3 + $0x8] sm:$0xff]   ;;  %v2870_v63 = vld [vmem:[%s4048_s3 + $0x40] sm:$0xff]   ;;  %v2872_v37 = vld [vmem:[%s4050_s5 + $0x38] sm:$0xff]  }
  0x87   :  { %2608 = vmatpush3.bf16.msra.mxu1 %v2861_v54  ;;  %v2871_v0 = vld [vmem:[%s4048_s3] sm:$0xff]   ;;  %v3552_v16 = vsub.s32 0, %v3549_v15  ;;  %v3558_v18 = vsub.s32 1, %v3549_v15  ;;  %v2873_v39 = vld [vmem:[%s4050_s5 + $0x30] sm:$0xff]   ;;  %v2874_v40 = vld [vmem:[%s4050_s5 + $0x28] sm:$0xff]  }
  0x88   :  { %2609 = vmatprep.subr.bf16.mxu1 %v2862_v55  ;;  %v158_v17 = vld [vmem:[%s4047_s2] sm:$0x3]  ;;  %v2876_v42 = vld [vmem:[%s4050_s5 + $0x18] sm:$0xff]   ;;  %v2877_v43 = vld [vmem:[%s4050_s5 + $0x10] sm:$0xff]  }
  0x89   :  { %v163_v20 = vrot.slane %v158_v17, %v3552_v16  ;;  %v167_v21 = vrot.slane %v158_v17, %v3558_v18  ;;  %v2875_v41 = vld [vmem:[%s4050_s5 + $0x20] sm:$0xff]   ;;  %v2878_v44 = vld [vmem:[%s4050_s5 + $0x8] sm:$0xff]   ;;  %v2880_v46 = vld [vmem:[%s4052_s7 + $0x38] sm:$0xff]  }
  0x8a   :  { %v2879_v45 = vld [vmem:[%s4050_s5] sm:$0xff]   ;;  %2686 = vmatpush3.bf16.msra.mxu0 %v2880_v46  ;;  %v2881_v47 = vld [vmem:[%s4052_s7 + $0x30] sm:$0xff]   ;;  %v2882_v48 = vld [vmem:[%s4052_s7 + $0x28] sm:$0xff]  }
  0x8b   :  { %2610 = vmatpush3.bf16.msra.mxu1 %v2863_v56  ;;  %2687 = vmatprep.subr.bf16.mxu0 %v3109_v1  ;;  %v2883_v49 = vld [vmem:[%s4052_s7 + $0x20] sm:$0xff]   ;;  %v2884_v50 = vld [vmem:[%s4052_s7 + $0x18] sm:$0xff]   ;;  %v2885_v51 = vld [vmem:[%s4052_s7 + $0x10] sm:$0xff]  }
  0x8c   :  { %2611 = vmatprep.subr.bf16.mxu1 %v2864_v57  ;;  %v2440_v53 = vld [vmem:[%s4049_s4] ss:$0 sm:$0xff]  ;;  %v2966_v46 = vld [vmem:[%s4056_s11 + $0x310] ss:$28 sps:$4 sm:$0xff]  }
  0x8e   :  { %2688 = vmatpush3.bf16.msra.mxu0 %v2881_v47  ;;  %v2974_v47 = vld [vmem:[%s4056_s11 + $0x2dc] ss:$28 sps:$4 sm:$0xff]  }
  0x8f   :  { %2612 = vmatpush3.bf16.msra.mxu1 %v2865_v58  ;;  %2689 = vmatprep.subr.bf16.mxu0 %v3109_v1 }
  0x90   :  { %2613 = vmatprep.subr.bf16.mxu1 %v2866_v59 }
  0x92   :  { %2690 = vmatpush3.bf16.msra.mxu0 %v2882_v48  ;;  %v2972_v48 = vld [vmem:[%s4056_s11 + $0x2d8] ss:$28 sps:$4 sm:$0xff]  }
  0x93   :  { %2614 = vmatpush3.bf16.msra.mxu1 %v2867_v60  ;;  %2691 = vmatprep.subr.bf16.mxu0 %v3109_v1 }
  0x94   :  { %2615 = vmatprep.subr.bf16.mxu1 %v2868_v61  ;;  %v2886_v61 = vld [vmem:[%s4052_s7 + $0x8] sm:$0xff]  }
  0x96   :  { %2692 = vmatpush3.bf16.msra.mxu0 %v2883_v49  ;;  %v2980_v49 = vld [vmem:[%s4056_s11 + $0x2a4] ss:$28 sps:$4 sm:$0xff]  }
  0x97   :  { %2616 = vmatpush3.bf16.msra.mxu1 %v2869_v62  ;;  %2693 = vmatprep.subr.bf16.mxu0 %v3109_v1  ;;  %v2887_v62 = vld [vmem:[%s4052_s7] sm:$0xff]  }
  0x98   :  { %2617 = vmatprep.subr.bf16.mxu1 %v2870_v63  ;;  %v2888_v63 = vld [vmem:[%s4054_s9 + $0x70] ss:$8 sps:$4 sm:$0xff]  }
  0x9a   :  { %2694 = vmatpush3.bf16.msra.mxu0 %v2884_v50  ;;  %v2978_v50 = vld [vmem:[%s4056_s11 + $0x2a0] ss:$28 sps:$4 sm:$0xff]  }
  0x9b   :  { %2618 = vmatpush3.bf16.msra.mxu1 %v2871_v0  ;;  %2695 = vmatprep.subr.bf16.mxu0 %v3109_v1  ;;  %v2893_v0 = vld [vmem:[%s4054_s9 + $0x64] ss:$8 sps:$4 sm:$0xff]  }
  0x9c   :  { %2665 = vmatprep.subr.bf16.mxu1 %v3109_v1 }
  0x9e   :  { %2696 = vmatpush3.bf16.msra.mxu0 %v2885_v51  ;;  %v2986_v51 = vld [vmem:[%s4056_s11 + $0x26c] ss:$28 sps:$4 sm:$0xff]  }
  0x9f   :  { %2697 = vmatprep.subr.bf16.mxu0 %v3109_v1 }
  0xa2   :  { %2698 = vmatpush3.bf16.msra.mxu0 %v2886_v61  ;;  %v2915_v61 = vld [vmem:[%s4056_s11 + $0x190] ss:$28 sps:$4 sm:$0xff]  }
  0xa3   :  { %2699 = vmatprep.subr.bf16.mxu0 %v3109_v1 }
  0xa6   :  { %2700 = vmatpush3.bf16.msra.mxu0 %v2887_v62 }
 0x102   :  { %v698_v2 = vpop.f32.mrf.mxu0 }
 0x103   :  { %v739_v4 = vpop.f32.mrf.mxu1  ;;  %v699_v22 = vadd.f32 %v698_v2, %v163_v20  ;;  %v2896_v2 = vld [vmem:[%s4054_s9 + $0x54] ss:$8 sps:$4 sm:$0xff]  }
 0x104   :  { %v700_v3 = vpop.f32.mrf.mxu0 }
 0x105   :  { %v741_v6 = vpop.f32.mrf.mxu1  ;;  %v701_v23 = vadd.f32 %v700_v3, %v167_v21  ;;  %v740_v24 = vadd.f32 %v739_v4, %v699_v22  ;;  %v2894_v3 = vld [vmem:[%s4054_s9 + $0x50] ss:$8 sps:$4 sm:$0xff]   ;;  %v2899_v4 = vld [vmem:[%s4054_s9 + $0x44] ss:$8 sps:$4 sm:$0xff]  }
 0x106   :  { %v702_v5 = vpop.f32.mrf.mxu0 }
 0x107   :  { %v743_v8 = vpop.f32.mrf.mxu1  ;;  %v742_v26 = vadd.f32 %v741_v6, %v701_v23  ;;  %v2897_v5 = vld [vmem:[%s4054_s9 + $0x40] ss:$8 sps:$4 sm:$0xff]   ;;  %v2902_v6 = vld [vmem:[%s4054_s9 + $0x34] ss:$8 sps:$4 sm:$0xff]  }
 0x108   :  { %v703_v7 = vpop.f32.mrf.mxu0  ;;  %v2905_v8 = vld [vmem:[%s4054_s9 + $0x24] ss:$8 sps:$4 sm:$0xff]  }
 0x109   :  { %v744_v9 = vpop.f32.mrf.mxu1  ;;  %v2900_v7 = vld [vmem:[%s4054_s9 + $0x30] ss:$8 sps:$4 sm:$0xff]  }
 0x10a   :  { %v2903_v9 = vld [vmem:[%s4054_s9 + $0x20] ss:$8 sps:$4 sm:$0xff]  }
 0x10b   :  { %v821_v10 = vpop.f32.mrf.mxu1 }
 0x10d   :  { %v823_v11 = vpop.f32.mrf.mxu1 }
 0x10f   :  { %v825_v12 = vpop.f32.mrf.mxu1 }
 0x110   :  { %v2457_v12 = vld [vmem:[%s4051_s6] ss:$0 sm:$0xff] }
 0x111   :  { %v826_v13 = vpop.f32.mrf.mxu1 }
 0x142   :  { %v780_v25 = vpop.f32.mrf.mxu0 }
 0x143   :  { %v781_v27 = vadd.f32 %v780_v25, %v740_v24  ;;  %v2911_v24 = vld [vmem:[%s4054_s9 + $0x4] ss:$8 sps:$4 sm:$0xff]   ;;  %v2909_v25 = vld [vmem:[%s4054_s9] ss:$8 sps:$4 sm:$0xff]  }
 0x144   :  { %v782_v28 = vpop.f32.mrf.mxu0 }
 0x145   :  { %v822_v29 = vadd.f32 %v821_v10, %v781_v27  ;;  %v783_v30 = vadd.f32 %v782_v28, %v742_v26  ;;  %v2908_v10 = vld [vmem:[%s4054_s9 + $0x14] ss:$8 sps:$4 sm:$0xff]   ;;  %v2912_v26 = vld [vmem:[%s4056_s11 + $0x188] ss:$28 sps:$4 sm:$0xff]  }
 0x146   :  { %v784_v31 = vpop.f32.mrf.mxu0  ;;  %v2914_v27 = vld [vmem:[%s4056_s11 + $0x18c] ss:$28 sps:$4 sm:$0xff]   ;;  %v2917_v28 = vld [vmem:[%s4056_s11 + $0x194] ss:$28 sps:$4 sm:$0xff]  }
 0x147   :  { %v824_v32 = vadd.f32 %v823_v11, %v783_v30  ;;  %v828_v33 = vmax.f32 %v822_v29, 0.0  ;;  %v2906_v11 = vld [vmem:[%s4054_s9 + $0x10] ss:$8 sps:$4 sm:$0xff]   ;;  %2129 = vmatprep.subr.bf16.mxu0 %v2914_v27 }
 0x148   :  { %v785_v34 = vpop.f32.mrf.mxu0  ;;  %v2920_v29 = vld [vmem:[%s4056_s11 + $0x154] ss:$28 sps:$4 sm:$0xff]   ;;  %v2926_v31 = vld [vmem:[%s4056_s11 + $0x11c] ss:$28 sps:$4 sm:$0xff]  }
 0x149   :  { %v829_v35 = vmax.f32 %v824_v32, 0.0  ;;  %v830_v38 = vpack.c.bf16 %v828_v33, %v828_v33  ;;  %v2918_v30 = vld [vmem:[%s4056_s11 + $0x150] ss:$28 sps:$4 sm:$0xff]   ;;  %v2924_v32 = vld [vmem:[%s4056_s11 + $0x118] ss:$28 sps:$4 sm:$0xff]  }
 0x14a   :  { %v2932_v33 = vld [vmem:[%s4056_s11 + $0xe4] ss:$28 sps:$4 sm:$0xff]   ;;  %v2995_v27 = vld [vmem:[%s4056_s11 + $0x23c] ss:$28 sps:$4 sm:$0xff]  }
 0x14b   :  { %v831_v36 = vpack.c.bf16 %v829_v35, %v829_v35  ;;  %v2930_v34 = vld [vmem:[%s4056_s11 + $0xe0] ss:$28 sps:$4 sm:$0xff]   ;;  %v2938_v35 = vld [vmem:[%s4056_s11 + $0xac] ss:$28 sps:$4 sm:$0xff]  }
 0x14d   :  { %999 = vmatprep.mubr.bf16.mxu1 %v831_v36  ;;  %v2936_v36 = vld [vmem:[%s4056_s11 + $0xa8] ss:$28 sps:$4 sm:$0xff]  }
 0x14e   :  { %1000 = vmatmul.mubr.bf16.vlgmr.msra.gmra.mxu1 %v830_v38  ;;  %v2942_v38 = vld [vmem:[%s4056_s11 + $0x70] ss:$28 sps:$4 sm:$0xff]  }
 0x14f   :  { %2666 = vmatpush3.bf16.msra.mxu1 %v2872_v37  ;;  %2681 = vmatprep.mubr.msk.bf16.mxu1 %vm3110_vm1, %v3109_v1  ;;  %v2944_v37 = vld [vmem:[%s4056_s11 + $0x74] ss:$28 sps:$4 sm:$0xff]  }
 0x150   :  { %2667 = vmatprep.subr.bf16.mxu1 %v3109_v1 }
 0x153   :  { %2668 = vmatpush3.bf16.msra.mxu1 %v2873_v39  ;;  %v2950_v39 = vld [vmem:[%s4056_s11 + $0x3c] ss:$28 sps:$4 sm:$0xff]  }
 0x154   :  { %2669 = vmatprep.subr.bf16.mxu1 %v3109_v1 }
 0x157   :  { %2670 = vmatpush3.bf16.msra.mxu1 %v2874_v40  ;;  %v2948_v40 = vld [vmem:[%s4056_s11 + $0x38] ss:$28 sps:$4 sm:$0xff]  }
 0x158   :  { %2671 = vmatprep.subr.bf16.mxu1 %v3109_v1 }
 0x15b   :  { %2672 = vmatpush3.bf16.msra.mxu1 %v2875_v41  ;;  %v2956_v41 = vld [vmem:[%s4056_s11 + $0x4] ss:$28 sps:$4 sm:$0xff]  }
 0x15c   :  { %2673 = vmatprep.subr.bf16.mxu1 %v3109_v1 }
 0x15f   :  { %2674 = vmatpush3.bf16.msra.mxu1 %v2876_v42  ;;  %v2954_v42 = vld [vmem:[%s4056_s11] ss:$28 sps:$4 sm:$0xff]  }
 0x160   :  { %2675 = vmatprep.subr.bf16.mxu1 %v3109_v1 }
 0x163   :  { %2676 = vmatpush3.bf16.msra.mxu1 %v2877_v43  ;;  %v2962_v43 = vld [vmem:[%s4056_s11 + $0x34c] ss:$28 sps:$4 sm:$0xff]  }
 0x164   :  { %2677 = vmatprep.subr.bf16.mxu1 %v3109_v1 }
 0x167   :  { %2678 = vmatpush3.bf16.msra.mxu1 %v2878_v44  ;;  %v2960_v44 = vld [vmem:[%s4056_s11 + $0x348] ss:$28 sps:$4 sm:$0xff]  }
 0x168   :  { %2679 = vmatprep.subr.bf16.mxu1 %v3109_v1  ;;  %v2891_v1 = vld [vmem:[%s4054_s9 + $0x60] ss:$8 sps:$4 sm:$0xff]  }
 0x16b   :  { %2680 = vmatpush3.bf16.msra.mxu1 %v2879_v45  ;;  %v2968_v45 = vld [vmem:[%s4056_s11 + $0x314] ss:$28 sps:$4 sm:$0xff]  }
 0x20e   :  { %v2619_v52 = vpop.f32.mrf.mxu1 }
 0x210   :  { %v2620_v54 = vpop.f32.mrf.mxu1 }
 0x211   :  { %v2621_v55 = vadd.f32 %v2620_v54, %v2619_v52  ;;  %v2984_v52 = vld [vmem:[%s4056_s11 + $0x268] ss:$28 sps:$4 sm:$0xff]   ;;  %v2990_v54 = vld [vmem:[%s4056_s11 + $0x230] ss:$28 sps:$4 sm:$0xff]  }
 0x212   :  { %v2622_v56 = vpop.f32.mrf.mxu1 }
 0x213   :  { %v1002_v57 = vadd.f32 %v2621_v55, %v2440_v53  ;;  %v2992_v53 = vld [vmem:[%s4056_s11 + $0x234] ss:$28 sps:$4 sm:$0xff]   ;;  %v2466_v55 = vld [vmem:[%s4053_s8] ss:$0 sm:$0xff] }
 0x214   :  { %v2623_v58 = vpop.f32.mrf.mxu1 }
 0x215   :  { %v1007_v59 = vmax.f32 %v1002_v57, 0.0 }
 0x217   :  { %v1008_v60 = vpack.c.bf16 %v1007_v59, %v1007_v59 }
 0x219   :  { %2682 = vmatmul.mubr.bf16.vlgmr.msra.gmra.mxu1 %v1008_v60 }
 0x21a   :  { %1375 = vmatprep.mubr.bf16.mxu1 %v3108_v19  ;;  %v2890_v19 = vld [vmem:[%s4054_s9 + $0x74] ss:$8 sps:$4 sm:$0xff]  }
 0x21b   :  { %1343 = vmatprep.subr.bf16.mxu1 %v2890_v19 }
 0x21c   :  { %1344 = vmatpush1.bf16.msra.mxu1 %v2888_v63  ;;  %v2923_v63 = vld [vmem:[%s4056_s11 + $0x15c] ss:$28 sps:$4 sm:$0xff]  }
 0x21d   :  { %1345 = vmatprep.subr.bf16.mxu1 %v2893_v0  ;;  %v2921_v0 = vld [vmem:[%s4056_s11 + $0x158] ss:$28 sps:$4 sm:$0xff]  }
 0x220   :  { %1346 = vmatpush1.bf16.msra.mxu1 %v2891_v1  ;;  %v2929_v1 = vld [vmem:[%s4056_s11 + $0x124] ss:$28 sps:$4 sm:$0xff]  }
 0x221   :  { %1347 = vmatprep.subr.bf16.mxu1 %v2896_v2  ;;  %v2927_v2 = vld [vmem:[%s4056_s11 + $0x120] ss:$28 sps:$4 sm:$0xff]  }
 0x224   :  { %1348 = vmatpush1.bf16.msra.mxu1 %v2894_v3  ;;  %v2935_v3 = vld [vmem:[%s4056_s11 + $0xec] ss:$28 sps:$4 sm:$0xff]  }
 0x225   :  { %1349 = vmatprep.subr.bf16.mxu1 %v2899_v4  ;;  %v2933_v4 = vld [vmem:[%s4056_s11 + $0xe8] ss:$28 sps:$4 sm:$0xff]  }
 0x228   :  { %1350 = vmatpush1.bf16.msra.mxu1 %v2897_v5  ;;  %v2941_v5 = vld [vmem:[%s4056_s11 + $0xb4] ss:$28 sps:$4 sm:$0xff]  }
 0x229   :  { %1351 = vmatprep.subr.bf16.mxu1 %v2902_v6  ;;  %v2939_v6 = vld [vmem:[%s4056_s11 + $0xb0] ss:$28 sps:$4 sm:$0xff]  }
 0x22c   :  { %1352 = vmatpush1.bf16.msra.mxu1 %v2900_v7  ;;  %v2947_v7 = vld [vmem:[%s4056_s11 + $0x7c] ss:$28 sps:$4 sm:$0xff]  }
 0x22d   :  { %1353 = vmatprep.subr.bf16.mxu1 %v2905_v8  ;;  %v2945_v8 = vld [vmem:[%s4056_s11 + $0x78] ss:$28 sps:$4 sm:$0xff]  }
 0x230   :  { %1354 = vmatpush1.bf16.msra.mxu1 %v2903_v9  ;;  %v2953_v9 = vld [vmem:[%s4056_s11 + $0x44] ss:$28 sps:$4 sm:$0xff]  }
 0x231   :  { %1355 = vmatprep.subr.bf16.mxu1 %v2908_v10  ;;  %v2951_v10 = vld [vmem:[%s4056_s11 + $0x40] ss:$28 sps:$4 sm:$0xff]  }
 0x234   :  { %1356 = vmatpush1.bf16.msra.mxu1 %v2906_v11  ;;  %v2959_v11 = vld [vmem:[%s4056_s11 + $0xc] ss:$28 sps:$4 sm:$0xff]  }
 0x235   :  { %1357 = vmatprep.subr.bf16.mxu1 %v2911_v24  ;;  %v2981_v24 = vld [vmem:[%s4056_s11 + $0x2a8] ss:$28 sps:$4 sm:$0xff]  }
 0x238   :  { %1358 = vmatpush1.bf16.msra.mxu1 %v2909_v25  ;;  %v2989_v25 = vld [vmem:[%s4056_s11 + $0x274] ss:$28 sps:$4 sm:$0xff]  }
 0x239   :  { %2170 = vmatprep.subr.bf16.mxu1 %v2917_v28  ;;  %v2993_v28 = vld [vmem:[%s4056_s11 + $0x238] ss:$28 sps:$4 sm:$0xff]  }
 0x2d9   :  { %v1114_v13 = vpop.f32.mrf.mxu1 }
 0x2da   :  { %v1115_v14 = vadd.f32 %v2457_v12, %v1114_v13  ;;  %v2957_v12 = vld [vmem:[%s4056_s11 + $0x8] ss:$28 sps:$4 sm:$0xff]   ;;  %v2965_v13 = vld [vmem:[%s4056_s11 + $0x354] ss:$28 sps:$4 sm:$0xff]  }
 0x2db   :  { %v2683_v17 = vpop.f32.mrf.mxu1 }
 0x2dc   :  { %v1120_v20 = vmax.f32 %v1115_v14, 0.0  ;;  %v2963_v14 = vld [vmem:[%s4056_s11 + $0x350] ss:$28 sps:$4 sm:$0xff]   ;;  %v2971_v17 = vld [vmem:[%s4056_s11 + $0x31c] ss:$28 sps:$4 sm:$0xff]  }
 0x2dd   :  { %v1117_v21 = vpop.f32.mrf.mxu1 }
 0x2de   :  { %v1121_v22 = vpack.c.bf16 %v1120_v20, %v1120_v20  ;;  %v2969_v20 = vld [vmem:[%s4056_s11 + $0x318] ss:$28 sps:$4 sm:$0xff]   ;;  %v2977_v21 = vld [vmem:[%s4056_s11 + $0x2e4] ss:$28 sps:$4 sm:$0xff]  }
 0x2df   :  { %v2684_v23 = vpop.f32.mrf.mxu1 }
 0x2e0   :  { %2702 = vmatmul.mubr.bf16.vlgmr.msra.gmra.mxu0 %v1121_v22  ;;  %v2975_v22 = vld [vmem:[%s4056_s11 + $0x2e0] ss:$28 sps:$4 sm:$0xff]   ;;  %v2983_v23 = vld [vmem:[%s4056_s11 + $0x2ac] ss:$28 sps:$4 sm:$0xff]  }
 0x2e1   :  { %2130 = vmatpush1.bf16.msra.mxu0 %v2912_v26  ;;  %v2987_v26 = vld [vmem:[%s4056_s11 + $0x270] ss:$28 sps:$4 sm:$0xff]  }
 0x2e2   :  { %2131 = vmatprep.subr.bf16.mxu0 %v2920_v29  ;;  %v2998_v29 = vld [vmem:[%s4056_s11 + $0x1fc] ss:$28 sps:$4 sm:$0xff]  }
 0x2e5   :  { %2132 = vmatpush1.bf16.msra.mxu0 %v2918_v30  ;;  %v3001_v30 = vld [vmem:[%s4056_s11 + $0x204] ss:$28 sps:$4 sm:$0xff]  }
 0x2e6   :  { %2133 = vmatprep.subr.bf16.mxu0 %v2926_v31  ;;  %v2996_v31 = vld [vmem:[%s4056_s11 + $0x1f8] ss:$28 sps:$4 sm:$0xff]  }
 0x2e9   :  { %2134 = vmatpush1.bf16.msra.mxu0 %v2924_v32  ;;  %v2999_v32 = vld [vmem:[%s4056_s11 + $0x200] ss:$28 sps:$4 sm:$0xff]  }
 0x2ea   :  { %2135 = vmatprep.subr.bf16.mxu0 %v2932_v33  ;;  %v3004_v33 = vld [vmem:[%s4056_s11 + $0x1c4] ss:$28 sps:$4 sm:$0xff]  }
 0x2ed   :  { %2136 = vmatpush1.bf16.msra.mxu0 %v2930_v34  ;;  %v3007_v34 = vld [vmem:[%s4056_s11 + $0x1cc] ss:$28 sps:$4 sm:$0xff]  }
 0x2ee   :  { %2137 = vmatprep.subr.bf16.mxu0 %v2938_v35  ;;  %v3002_v35 = vld [vmem:[%s4056_s11 + $0x1c0] ss:$28 sps:$4 sm:$0xff]  }
 0x2f1   :  { %2138 = vmatpush1.bf16.msra.mxu0 %v2936_v36  ;;  %v3005_v36 = vld [vmem:[%s4056_s11 + $0x1c8] ss:$28 sps:$4 sm:$0xff]  }
 0x2f2   :  { %2139 = vmatprep.subr.bf16.mxu0 %v2944_v37  ;;  %v3010_v37 = vld [vmem:[%s4056_s11 + $0x19c] ss:$28 sps:$4 sm:$0xff]  }
 0x2f5   :  { %2140 = vmatpush1.bf16.msra.mxu0 %v2942_v38  ;;  %v3011_v38 = vld [vmem:[%s4056_s11 + $0x360] ss:$28 sps:$4 sm:$0xff]  }
 0x2f6   :  { %2141 = vmatprep.subr.bf16.mxu0 %v2950_v39  ;;  %v1251_v39 = vld [vmem:[%s4055_s10] sm:$0x3] }
 0x2f9   :  { %2142 = vmatpush1.bf16.msra.mxu0 %v2948_v40  ;;  %v1256_v40 = vrot.slane %v1251_v39, %v3552_v16 }
 0x2fa   :  { %2143 = vmatprep.subr.bf16.mxu0 %v2956_v41  ;;  %v1260_v41 = vrot.slane %v1251_v39, %v3558_v18  ;;  %v1532_v39 = vsub.s32 3, %v3549_v15 }
 0x2fd   :  { %2144 = vmatpush1.bf16.msra.mxu0 %v2954_v42 }
 0x2fe   :  { %2145 = vmatprep.subr.bf16.mxu0 %v2962_v43 }
 0x301   :  { %2146 = vmatpush2.bf16.msra.mxu0 %v2960_v44 }
 0x302   :  { %2147 = vmatprep.subr.bf16.mxu0 %v2968_v45 }
 0x305   :  { %2148 = vmatpush2.bf16.msra.mxu0 %v2966_v46 }
 0x306   :  { %2149 = vmatprep.subr.bf16.mxu0 %v2974_v47 }
 0x309   :  { %2150 = vmatpush2.bf16.msra.mxu0 %v2972_v48 }
 0x30a   :  { %2151 = vmatprep.subr.bf16.mxu0 %v2980_v49 }
 0x30d   :  { %2152 = vmatpush2.bf16.msra.mxu0 %v2978_v50 }
 0x30e   :  { %2153 = vmatprep.subr.bf16.mxu0 %v2986_v51  ;;  %v3008_v51 = vld [vmem:[%s4056_s11 + $0x198] ss:$28 sps:$4 sm:$0xff]  }
 0x311   :  { %2154 = vmatpush2.bf16.msra.mxu0 %v2984_v52  ;;  %v3012_v52 = vld [vmem:[%s4056_s11 + $0x1a0] ss:$28 sps:$4 sm:$0xff]  }
 0x312   :  { %2155 = vmatprep.subr.bf16.mxu0 %v2992_v53 }
 0x315   :  { %2156 = vmatpush2.bf16.msra.mxu0 %v2990_v54  ;;  %v3015_v54 = vld [vmem:[%s4056_s11 + $0x164] ss:$28 sps:$4 sm:$0xff]  }
 0x316   :  { %2157 = vmatprep.subr.bf16.mxu0 %v2998_v29  ;;  %v3062_v29 = vld [vmem:[%s4056_s11 + $0x27c] ss:$28 sps:$4 sm:$0xff]  }
 0x319   :  { %2158 = vmatpush2.bf16.msra.mxu0 %v2996_v31  ;;  %v3065_v31 = vld [vmem:[%s4056_s11 + $0x244] ss:$28 sps:$4 sm:$0xff]  }
 0x31a   :  { %2159 = vmatprep.subr.bf16.mxu0 %v3004_v33  ;;  %v3068_v33 = vld [vmem:[%s4056_s11 + $0x20c] ss:$28 sps:$4 sm:$0xff]  }
 0x31d   :  { %2160 = vmatpush2.bf16.msra.mxu0 %v3002_v35  ;;  %v3071_v35 = vld [vmem:[%s4056_s11 + $0x1d4] ss:$28 sps:$4 sm:$0xff]  }
 0x31e   :  { %2211 = vmatprep.subr.bf16.mxu0 %v3010_v37  ;;  %v1528_v37 = vsub.s32 2, %v3549_v15 }
 0x3a0   :  { %v1227_v56 = vpop.f32.mrf.mxu0 }
 0x3a1   :  { %v1228_v57 = vadd.f32 %v2466_v55, %v1227_v56  ;;  %v3016_v55 = vld [vmem:[%s4056_s11 + $0x328] ss:$28 sps:$4 sm:$0xff]   ;;  %v3013_v56 = vld [vmem:[%s4056_s11 + $0x160] ss:$28 sps:$4 sm:$0xff]  }
 0x3a2   :  { %v2703_v58 = vpop.f32.mrf.mxu0 }
 0x3a3   :  { %v1233_v59 = vmax.f32 %v1228_v57, 0.0  ;;  %v3017_v57 = vld [vmem:[%s4056_s11 + $0x168] ss:$28 sps:$4 sm:$0xff]  }
 0x3a4   :  { %v1230_v60 = vpop.f32.mrf.mxu0  ;;  %v3020_v58 = vld [vmem:[%s4056_s11 + $0x12c] ss:$28 sps:$4 sm:$0xff]  }
 0x3a5   :  { %v1234_v62 = vpack.c.bf16 %v1233_v59, %v1233_v59  ;;  %v3021_v59 = vld [vmem:[%s4056_s11 + $0x2f0] ss:$28 sps:$4 sm:$0xff]   ;;  %v3018_v60 = vld [vmem:[%s4056_s11 + $0x128] ss:$28 sps:$4 sm:$0xff]  }
 0x3a6   :  { %v2704_v19 = vpop.f32.mrf.mxu0 }
 0x3a7   :  { %1376 = vmatmul.mubr.bf16.vlgmr.msra.gmra.mxu1 %v1234_v62  ;;  %v3025_v62 = vld [vmem:[%s4056_s11 + $0xf4] ss:$28 sps:$4 sm:$0xff]  }
 0x3a8   :  { %2171 = vmatpush1.bf16.msra.mxu1 %v2915_v61  ;;  %v3022_v61 = vld [vmem:[%s4056_s11 + $0x130] ss:$28 sps:$4 sm:$0xff]  }
 0x3a9   :  { %2172 = vmatprep.subr.bf16.mxu1 %v2923_v63  ;;  %v3026_v63 = vld [vmem:[%s4056_s11 + $0x2b8] ss:$28 sps:$4 sm:$0xff]   ;;  %v3023_v19 = vld [vmem:[%s4056_s11 + $0xf0] ss:$28 sps:$4 sm:$0xff]  }
 0x3ac   :  { %2173 = vmatpush1.bf16.msra.mxu1 %v2921_v0  ;;  %v3027_v0 = vld [vmem:[%s4056_s11 + $0xf8] ss:$28 sps:$4 sm:$0xff]  }
 0x3ad   :  { %2174 = vmatprep.subr.bf16.mxu1 %v2929_v1  ;;  %v3030_v1 = vld [vmem:[%s4056_s11 + $0xbc] ss:$28 sps:$4 sm:$0xff]  }
 0x3b0   :  { %2175 = vmatpush1.bf16.msra.mxu1 %v2927_v2  ;;  %v3031_v2 = vld [vmem:[%s4056_s11 + $0x280] ss:$28 sps:$4 sm:$0xff]  }
 0x3b1   :  { %2176 = vmatprep.subr.bf16.mxu1 %v2935_v3  ;;  %v3028_v3 = vld [vmem:[%s4056_s11 + $0xb8] ss:$28 sps:$4 sm:$0xff]  }
 0x3b4   :  { %2177 = vmatpush1.bf16.msra.mxu1 %v2933_v4  ;;  %v3032_v4 = vld [vmem:[%s4056_s11 + $0xc0] ss:$28 sps:$4 sm:$0xff]  }
 0x3b5   :  { %2178 = vmatprep.subr.bf16.mxu1 %v2941_v5  ;;  %v3035_v5 = vld [vmem:[%s4056_s11 + $0x84] ss:$28 sps:$4 sm:$0xff]  }
 0x3b8   :  { %2179 = vmatpush1.bf16.msra.mxu1 %v2939_v6  ;;  %v3036_v6 = vld [vmem:[%s4056_s11 + $0x248] ss:$28 sps:$4 sm:$0xff]  }
 0x3b9   :  { %2180 = vmatprep.subr.bf16.mxu1 %v2947_v7  ;;  %v3033_v7 = vld [vmem:[%s4056_s11 + $0x80] ss:$28 sps:$4 sm:$0xff]  }
 0x3bc   :  { %2181 = vmatpush1.bf16.msra.mxu1 %v2945_v8  ;;  %v3037_v8 = vld [vmem:[%s4056_s11 + $0x88] ss:$28 sps:$4 sm:$0xff]  }
 0x3bd   :  { %2182 = vmatprep.subr.bf16.mxu1 %v2953_v9  ;;  %v3040_v9 = vld [vmem:[%s4056_s11 + $0x4c] ss:$28 sps:$4 sm:$0xff]  }
 0x3c0   :  { %2183 = vmatpush1.bf16.msra.mxu1 %v2951_v10  ;;  %v3041_v10 = vld [vmem:[%s4056_s11 + $0x210] ss:$28 sps:$4 sm:$0xff]  }
 0x3c1   :  { %2184 = vmatprep.subr.bf16.mxu1 %v2959_v11  ;;  %v3038_v11 = vld [vmem:[%s4056_s11 + $0x48] ss:$28 sps:$4 sm:$0xff]  }
 0x3c4   :  { %2185 = vmatpush1.bf16.msra.mxu1 %v2957_v12  ;;  %v3042_v12 = vld [vmem:[%s4056_s11 + $0x50] ss:$28 sps:$4 sm:$0xff]  }
 0x3c5   :  { %2186 = vmatprep.subr.bf16.mxu1 %v2965_v13  ;;  %v3045_v13 = vld [vmem:[%s4056_s11 + $0x14] ss:$28 sps:$4 sm:$0xff]  }
 0x3c8   :  { %2187 = vmatpush2.bf16.msra.mxu1 %v2963_v14  ;;  %v3046_v14 = vld [vmem:[%s4056_s11 + $0x1d8] ss:$28 sps:$4 sm:$0xff]  }
 0x3c9   :  { %2188 = vmatprep.subr.bf16.mxu1 %v2971_v17  ;;  %v3043_v17 = vld [vmem:[%s4056_s11 + $0x10] ss:$28 sps:$4 sm:$0xff]  }
 0x3cc   :  { %2189 = vmatpush2.bf16.msra.mxu1 %v2969_v20  ;;  %v3047_v20 = vld [vmem:[%s4056_s11 + $0x18] ss:$28 sps:$4 sm:$0xff]  }
 0x3cd   :  { %2190 = vmatprep.subr.bf16.mxu1 %v2977_v21  ;;  %v3050_v21 = vld [vmem:[%s4056_s11 + $0x35c] ss:$28 sps:$4 sm:$0xff]  }
 0x3d0   :  { %2191 = vmatpush2.bf16.msra.mxu1 %v2975_v22  ;;  %v3048_v22 = vld [vmem:[%s4056_s11 + $0x358] ss:$28 sps:$4 sm:$0xff]  }
 0x3d1   :  { %2192 = vmatprep.subr.bf16.mxu1 %v2983_v23  ;;  %v3053_v23 = vld [vmem:[%s4056_s11 + $0x324] ss:$28 sps:$4 sm:$0xff]  }
 0x3d4   :  { %2193 = vmatpush2.bf16.msra.mxu1 %v2981_v24  ;;  %v3051_v24 = vld [vmem:[%s4056_s11 + $0x320] ss:$28 sps:$4 sm:$0xff]  }
 0x3d5   :  { %2194 = vmatprep.subr.bf16.mxu1 %v2989_v25  ;;  %v3056_v25 = vld [vmem:[%s4056_s11 + $0x2ec] ss:$28 sps:$4 sm:$0xff]  }
 0x3d8   :  { %2195 = vmatpush2.bf16.msra.mxu1 %v2987_v26  ;;  %v3054_v26 = vld [vmem:[%s4056_s11 + $0x2e8] ss:$28 sps:$4 sm:$0xff]  }
 0x3d9   :  { %2196 = vmatprep.subr.bf16.mxu1 %v2995_v27  ;;  %v3059_v27 = vld [vmem:[%s4056_s11 + $0x2b4] ss:$28 sps:$4 sm:$0xff]  }
 0x3dc   :  { %2197 = vmatpush2.bf16.msra.mxu1 %v2993_v28  ;;  %v3057_v28 = vld [vmem:[%s4056_s11 + $0x2b0] ss:$28 sps:$4 sm:$0xff]  }
 0x3dd   :  { %2198 = vmatprep.subr.bf16.mxu1 %v3001_v30  ;;  %v3060_v30 = vld [vmem:[%s4056_s11 + $0x278] ss:$28 sps:$4 sm:$0xff]  }
 0x3e0   :  { %2199 = vmatpush2.bf16.msra.mxu1 %v2999_v32  ;;  %v3063_v32 = vld [vmem:[%s4056_s11 + $0x240] ss:$28 sps:$4 sm:$0xff]  }
 0x3e1   :  { %2200 = vmatprep.subr.bf16.mxu1 %v3007_v34  ;;  %v3066_v34 = vld [vmem:[%s4056_s11 + $0x208] ss:$28 sps:$4 sm:$0xff]  }
 0x3e4   :  { %2201 = vmatpush2.bf16.msra.mxu1 %v3005_v36  ;;  %v3069_v36 = vld [vmem:[%s4056_s11 + $0x1d0] ss:$28 sps:$4 sm:$0xff]   ;;  %s3111_s11 = smov [#allocation2]  }
 0x3e5   :  { %2643 = vmatprep.subr.bf16.mxu1 %v3011_v38  ;;  %v1516_v38 = vld [vmem:[%s4057_s12] sm:$0x7f]  ;;  %s2333_s12 = sshll.u32 %s3111_s11, 4  ;;  %s2334_s12 = int_to_ptr.vmem [resolvable:$true] %s2333_s12 }
 0x3e6   :  { %s3086_s16 = scalar_lea.vmem %s2334_s12, 896  ;;  %p3091_p1 = scmp.lt.s32.totalorder %s2334_s12, %s2334_s12 }
 0x3e7   :  { %p3087_p0 = scmp.ne.s32.totalorder %s2334_s12, %s3086_s16  ;;  %p3092_p2 = scmp.lt.s32.totalorder %s3086_s16, %s3086_s16 }
 0x3e9   :  { %p3093_p3 = por %p3092_p2, %p3091_p1 }
 0x3eb   :  { %p3094_p4 = pnand %p3093_p3, %p3087_p0 }
 0x467   :  { %v1377_v42 = vpop.f32.mrf.mxu1 }
 0x468   :  { %v1378_v43 = vadd.f32 %v1377_v42, %v1256_v40  ;;  %v1521_v40 = vrot.slane %v1516_v38, %v3552_v16  ;;  %v1525_v42 = vrot.slane %v1516_v38, %v3558_v18 }
 0x469   :  { %v1379_v44 = vpop.f32.mrf.mxu1 }
 0x46a   :  { %v1380_v45 = vadd.f32 %v1379_v44, %v1260_v41  ;;  %v1384_v46 = vmax.f32 %v1378_v43, 0.0  ;;  %v1529_v41 = vrot.slane %v1516_v38, %v1528_v37  ;;  %v1533_v43 = vrot.slane %v1516_v38, %v1532_v39 }
 0x46b   :  { %v1381_v47 = vpop.f32.mrf.mxu1 }
 0x46c   :  { %v1385_v48 = vmax.f32 %v1380_v45, 0.0  ;;  %v3893_v53 = vpack.c.bf16 %v1384_v46, %v1384_v46 }
 0x46d   :  { %v1382_v49 = vpop.f32.mrf.mxu1 }
 0x46e   :  { %v1387_v50 = vpack.c.bf16 %v1385_v48, %v1385_v48 }
 0x470   :  { %2161 = vmatprep.mubr.bf16.mxu0 %v1387_v50  ;;  %2202 = vmatprep.mubr.bf16.mxu1 %v1387_v50 }
 0x471   :  { %2162 = vmatmul.mubr.bf16.vlgmr.msra.gmra.mxu0 %v3893_v53  ;;  %2203 = vmatmul.mubr.bf16.vlgmr.msra.gmra.mxu1 %v3893_v53 }
 0x472   :  { %2212 = vmatpush1.bf16.msra.mxu0 %v3008_v51  ;;  %2644 = vmatpush3.bf16.msra.mxu1 %v3012_v52 }
 0x473   :  { %2243 = vmatprep.mubr.bf16.mxu0 %v1387_v50  ;;  %2284 = vmatprep.mubr.bf16.mxu1 %v1387_v50 }
 0x474   :  { %2213 = vmatprep.subr.bf16.mxu0 %v3015_v54  ;;  %2645 = vmatprep.subr.bf16.mxu1 %v3016_v55 }
 0x476   :  { %2214 = vmatpush1.bf16.msra.mxu0 %v3013_v56  ;;  %2646 = vmatpush3.bf16.msra.mxu1 %v3017_v57 }
 0x477   :  { %2215 = vmatprep.subr.bf16.mxu0 %v3020_v58  ;;  %2647 = vmatprep.subr.bf16.mxu1 %v3021_v59 }
 0x47a   :  { %2216 = vmatpush1.bf16.msra.mxu0 %v3018_v60  ;;  %2648 = vmatpush3.bf16.msra.mxu1 %v3022_v61 }
 0x47b   :  { %2217 = vmatprep.subr.bf16.mxu0 %v3025_v62  ;;  %2649 = vmatprep.subr.bf16.mxu1 %v3026_v63 }
 0x47e   :  { %2218 = vmatpush1.bf16.msra.mxu0 %v3023_v19  ;;  %2650 = vmatpush3.bf16.msra.mxu1 %v3027_v0 }
 0x47f   :  { %2219 = vmatprep.subr.bf16.mxu0 %v3030_v1  ;;  %2651 = vmatprep.subr.bf16.mxu1 %v3031_v2 }
 0x482   :  { %2220 = vmatpush1.bf16.msra.mxu0 %v3028_v3  ;;  %2652 = vmatpush3.bf16.msra.mxu1 %v3032_v4 }
 0x483   :  { %2221 = vmatprep.subr.bf16.mxu0 %v3035_v5  ;;  %2653 = vmatprep.subr.bf16.mxu1 %v3036_v6  ;;  %v1544_v5 = vsub.s32 6, %v3549_v15 }
 0x486   :  { %2222 = vmatpush1.bf16.msra.mxu0 %v3033_v7  ;;  %2654 = vmatpush3.bf16.msra.mxu1 %v3037_v8  ;;  %v1545_v7 = vrot.slane %v1516_v38, %v1544_v5 }
 0x487   :  { %2223 = vmatprep.subr.bf16.mxu0 %v3040_v9  ;;  %2655 = vmatprep.subr.bf16.mxu1 %v3041_v10 }
 0x48a   :  { %2224 = vmatpush1.bf16.msra.mxu0 %v3038_v11  ;;  %2656 = vmatpush3.bf16.msra.mxu1 %v3042_v12 }
 0x48b   :  { %2225 = vmatprep.subr.bf16.mxu0 %v3045_v13  ;;  %2657 = vmatprep.subr.bf16.mxu1 %v3046_v14 }
 0x48e   :  { %2226 = vmatpush1.bf16.msra.mxu0 %v3043_v17  ;;  %2658 = vmatpush3.bf16.msra.mxu1 %v3047_v20 }
 0x48f   :  { %2227 = vmatprep.subr.bf16.mxu0 %v3050_v21  ;;  %v1536_v21 = vsub.s32 4, %v3549_v15 }
 0x491   :  { %2285 = vmatmul.mubr.bf16.vlgmr.msra.gmra.mxu1 %v3893_v53 }
 0x492   :  { %2228 = vmatpush2.bf16.msra.mxu0 %v3048_v22  ;;  %v1540_v22 = vsub.s32 5, %v3549_v15 }
 0x493   :  { %2229 = vmatprep.subr.bf16.mxu0 %v3053_v23  ;;  %v1537_v23 = vrot.slane %v1516_v38, %v1536_v21 }
 0x496   :  { %2230 = vmatpush2.bf16.msra.mxu0 %v3051_v24  ;;  %v1541_v24 = vrot.slane %v1516_v38, %v1540_v22 }
 0x497   :  { %2231 = vmatprep.subr.bf16.mxu0 %v3056_v25 }
 0x49a   :  { %2232 = vmatpush2.bf16.msra.mxu0 %v3054_v26 }
 0x49b   :  { %2233 = vmatprep.subr.bf16.mxu0 %v3059_v27 }
 0x49e   :  { %2234 = vmatpush2.bf16.msra.mxu0 %v3057_v28 }
 0x49f   :  { %2235 = vmatprep.subr.bf16.mxu0 %v3062_v29 }
 0x4a2   :  { %2236 = vmatpush2.bf16.msra.mxu0 %v3060_v30 }
 0x4a3   :  { %2237 = vmatprep.subr.bf16.mxu0 %v3065_v31 }
 0x4a6   :  { %2238 = vmatpush2.bf16.msra.mxu0 %v3063_v32 }
 0x4a7   :  { %2239 = vmatprep.subr.bf16.mxu0 %v3068_v33 }
 0x4aa   :  { %2240 = vmatpush2.bf16.msra.mxu0 %v3066_v34 }
 0x4ab   :  { %2241 = vmatprep.subr.bf16.mxu0 %v3071_v35 }
 0x4ae   :  { %2242 = vmatpush2.bf16.msra.mxu0 %v3069_v36 }
 0x4b1   :  { %2244 = vmatmul.mubr.bf16.vlgmr.msra.gmra.mxu0 %v3893_v53 }
 0x531   :  { %v2163_v44 = vpop.f32.mrf.mxu0  ;;  %v2204_v45 = vpop.f32.mrf.mxu1 }
 0x532   :  { %v2164_v46 = vadd.f32 %v2163_v44, %v1521_v40  ;;  %v2205_v47 = vadd.f32 %v2204_v45, %v1529_v41 }
 0x533   :  { %v2165_v48 = vpop.f32.mrf.mxu0  ;;  %v2206_v49 = vpop.f32.mrf.mxu1 }
 0x534   :  { %v2292_v50 = vmul.f32 0.5, %v2164_v46  ;;  %v2294_v51 = vmul.f32 0.5, %v2205_v47  ;;  %v2166_v52 = vadd.f32 %v2165_v48, %v1525_v42  ;;  %v2207_v53 = vadd.f32 %v2206_v49, %v1533_v43 }
 0x535   :  { %v2167_v54 = vpop.f32.mrf.mxu0  ;;  %v2208_v55 = vpop.f32.mrf.mxu1 }
 0x536   :  { %3072 = vtanh.f32 %v2292_v50  ;;  %v2293_v56 = vmul.f32 0.5, %v2166_v52  ;;  %v2295_v57 = vmul.f32 0.5, %v2207_v53 }
 0x537   :  { %3074 = vtanh.f32 %v2294_v51  ;;  %v2168_v16 = vpop.f32.mrf.mxu0  ;;  %v2209_v58 = vpop.f32.mrf.mxu1 }
 0x538   :  { %3076 = vtanh.f32 %v2293_v56 }
 0x539   :  { %3078 = vtanh.f32 %v2295_v57 }
 0x543   :  { %v3073_v18 = vpop.eup %3072 }
 0x544   :  { %v3075_v59 = vpop.eup %3074  ;;  %v2306_v60 = vmul.f32 0.5, %v3073_v18 }
 0x545   :  { %v3077_v61 = vpop.eup %3076  ;;  %v2308_v62 = vmul.f32 0.5, %v3075_v59 }
 0x546   :  { %v3079_v63 = vpop.eup %3078  ;;  %v2313_v19 = vadd.f32 0.5, %v2306_v60  ;;  %v2307_v0 = vmul.f32 0.5, %v3077_v61 }
 0x547   :  { %v2315_v1 = vadd.f32 0.5, %v2308_v62  ;;  %v2309_v2 = vmul.f32 0.5, %v3079_v63 }
 0x548   :  { %2320 = vst [vmem:[#allocation2] sm:$0xff] %v2313_v19  ;;  %v2314_v3 = vadd.f32 0.5, %v2307_v0 }
 0x549   :  { %2322 = vst [vmem:[#allocation2 + $0x10] sm:$0xff] %v2315_v1  ;;  %v2316_v4 = vadd.f32 0.5, %v2309_v2 }
 0x54a   :  { %2321 = vst [vmem:[#allocation2 + $0x8] sm:$0xff] %v2314_v3 }
 0x54b   :  { %2323 = vst [vmem:[#allocation2 + $0x18] sm:$0xff] %v2316_v4 }
 0x551   :  { %v2659_v6 = vpop.f32.mrf.mxu1 }
 0x553   :  { %v2660_v8 = vpop.f32.mrf.mxu1 }
 0x554   :  { %v2661_v9 = vadd.f32 %v2660_v8, %v2659_v6 }
 0x555   :  { %v2662_v10 = vpop.f32.mrf.mxu1 }
 0x556   :  { %v2287_v11 = vadd.f32 %v2661_v9, %v1545_v7 }
 0x557   :  { %v2663_v12 = vpop.f32.mrf.mxu1 }
 0x558   :  { %v2298_v13 = vmul.f32 0.5, %v2287_v11 }
 0x55a   :  { %3080 = vtanh.f32 %v2298_v13 }
 0x567   :  { %v3081_v14 = vpop.eup %3080 }
 0x568   :  { %v2312_v17 = vmul.f32 0.5, %v3081_v14 }
 0x56a   :  { %v2319_v20 = vadd.f32 0.5, %v2312_v17 }
 0x56c   :  { %2326 = vst.msk [vmem:[#allocation2 + $0x30] sm:$0xff] %vm660_vm0, %v2319_v20 }
 0x571   :  { %v2245_v25 = vpop.f32.mrf.mxu0 }
 0x572   :  { %v2246_v26 = vadd.f32 %v2245_v25, %v1537_v23 }
 0x573   :  { %v2247_v27 = vpop.f32.mrf.mxu0 }
 0x574   :  { %v2296_v28 = vmul.f32 0.5, %v2246_v26  ;;  %v2248_v29 = vadd.f32 %v2247_v27, %v1541_v24 }
 0x575   :  { %v2249_v30 = vpop.f32.mrf.mxu0 }
 0x576   :  { %3082 = vtanh.f32 %v2296_v28  ;;  %v2297_v31 = vmul.f32 0.5, %v2248_v29 }
 0x577   :  { %v2250_v32 = vpop.f32.mrf.mxu0 }
 0x578   :  { %3084 = vtanh.f32 %v2297_v31 }
 0x583   :  { %v3083_v33 = vpop.eup %3082 }
 0x584   :  { %v2310_v34 = vmul.f32 0.5, %v3083_v33 }
 0x585   :  { %v3085_v35 = vpop.eup %3084 }
 0x586   :  { %v2317_v36 = vadd.f32 0.5, %v2310_v34  ;;  %v2311_v37 = vmul.f32 0.5, %v3085_v35 }
 0x588   :  { %2324 = vst [vmem:[#allocation2 + $0x20] sm:$0xff] %v2317_v36  ;;  %v2318_v15 = vadd.f32 0.5, %v2311_v37 }
 0x58a   :  { %2325 = vst [vmem:[#allocation2 + $0x28] sm:$0xff] %v2318_v15 }
 0x58b   :  { %3097 = shalt.err (!%p3094_p4)
}
 0x58c   :  { %2336 = dma.vmem_to_hbm [thread:$0]  %s2334_s12, 896, %s4058_s13, [#allocation3]  }
 0x58d   :  { %3106 = dma.done.wait [#allocation3], 896  }
 0x58e   :  { %3107 = vsyncadd [#allocation3], 4294966400 }
 0x58f   :  { %2340 = vsyncpa [#allocation3], 1 }

</bundles_post_ra>
